<compile_context>
chip_gen: v7x
topology: tpu7x:2x2x1
jax: 0.10.0
libtpu: 0.0.40
codegen_flags: <defaults>
</compile_context>

<pallas_src>
import functools

import jax
import jax.numpy as jnp
from jax.experimental import pallas as pl
from jax.experimental.pallas import tpu as pltpu

BN_EPS = 1e-5
_LANE = 128
_K_SPLIT = 256                    # K tile when the contraction must be split
_VMEM_BUDGET = 12 * 1024 * 1024   # per-call tile residency budget (v5e-safe)
_VMEM_LIMIT = 32 * 1024 * 1024    # explicit scoped VMEM limit (< v7x physical)


def _round_up(x, m):
    return (x + m - 1) // m * m


# --------------------------------------------------------------------------
# Kernel 1: conv matmul (im2col GEMM) + per-tile BN partial statistics
# --------------------------------------------------------------------------
def _stats_epilogue(acc, y_ref, stats_ref, i, tm, m_valid):
    """Write conv tile (bf16) + per-tile [sum ; centered sumsq] (f32)."""
    rows_left = m_valid - i * tm                               # scalar int32
    row_ids = jax.lax.broadcasted_iota(jnp.int32, acc.shape, 0)
    mask = row_ids < rows_left                                 # pad-row mask
    inv_rows = 1.0 / jnp.minimum(rows_left, tm).astype(jnp.float32)
    ym = jnp.where(mask, acc, 0.0)
    sum_t = jnp.sum(ym, axis=0, keepdims=True)                 # [1, Cp]
    mean_t = sum_t * inv_rows
    cent = jnp.where(mask, acc - mean_t, 0.0)
    m2_t = jnp.sum(cent * cent, axis=0, keepdims=True)         # [1, Cp]
    stats_ref[...] = jnp.concatenate([sum_t[None], m2_t[None]], axis=1)
    y_ref[...] = acc.astype(y_ref.dtype)


def _conv_stats_kernel(a_ref, b_ref, y_ref, stats_ref, *scratch,
                       single_k, tm, m_valid):
    i = pl.program_id(0)
    if single_k:
        # Common path: MXU accumulates internally; no zero-init / RMW pass.
        acc = jnp.dot(a_ref[...], b_ref[...],
                      preferred_element_type=jnp.float32)
        _stats_epilogue(acc, y_ref, stats_ref, i, tm, m_valid)
    else:
        (acc_ref,) = scratch
        k = pl.program_id(1)

        @pl.when(k == 0)
        def _():
            acc_ref[...] = jnp.zeros_like(acc_ref)

        acc_ref[...] += jnp.dot(a_ref[...], b_ref[...],
                                preferred_element_type=jnp.float32)

        @pl.when(k == pl.num_programs(1) - 1)
        def _():
            _stats_epilogue(acc_ref[...], y_ref, stats_ref, i, tm, m_valid)


# --------------------------------------------------------------------------
# Kernel 2: BN scale/shift (+ residual) (+ ReLU), per M tile
# --------------------------------------------------------------------------
def _bn_apply_kernel(y_ref, scale_ref, shift_ref, *rest, relu, has_res):
    if has_res:
        res_ref, o_ref = rest
    else:
        (o_ref,) = rest
    out = y_ref[...].astype(jnp.float32) * scale_ref[...] + shift_ref[...]
    if has_res:
        out = out + res_ref[...].astype(jnp.float32)
    if relu:
        out = jnp.maximum(out, 0.0)
    o_ref[...] = out.astype(o_ref.dtype)


# --------------------------------------------------------------------------
# Tiling heuristic (VMEM-budget driven, safe on v5e/v6e/v7x)
# --------------------------------------------------------------------------
def _choose_tiles(M, K, Cp):
    def need(tm, tk, nk):
        acc = tm * Cp * 4 if nk > 1 else 0
        return (2 * tm * tk * 2        # a, double-buffered bf16
                + 2 * tk * Cp * 2      # b, double-buffered bf16
                + 2 * tm * Cp * 2      # y out, double-buffered bf16
                + acc                  # f32 accumulator scratch
                + 2 * 2 * Cp * 4)      # stats out
    for tm in (512, 256, 128):
        tm_eff = min(tm, _round_up(M, 8))
        if need(tm_eff, K, 1) <= _VMEM_BUDGET:
            return tm_eff, K           # single K step (no accumulate pass)
    tm_eff = min(128, _round_up(M, 8))
    tk = min(K, _K_SPLIT)
    while tm_eff > 8 and need(tm_eff, tk, 2) > _VMEM_BUDGET:
        tm_eff = max(8, tm_eff // 2)
    return tm_eff, tk


# --------------------------------------------------------------------------
# conv + BN (batch stats) [+ residual] [+ ReLU] on flattened patches
# --------------------------------------------------------------------------
def conv_bn_pallas(patches_bf16, w_packed, gamma_p, beta_p, c_out,
                   residual=None, relu=True):
    """[M, K] bf16 patches x [K, Cp] bf16 weights -> [M, c_out] bf16."""
    M, K = patches_bf16.shape
    Cp = w_packed.shape[1]
    TM, tk = _choose_tiles(M, K, Cp)
    Mp, Kp = _round_up(M, TM), _round_up(K, tk)
    nm, nk = Mp // TM, Kp // tk
    single_k = nk == 1

    a = patches_bf16
    if (Mp, Kp) != (M, K):
        a = jnp.pad(a, ((0, Mp - M), (0, Kp - K)))
    b = w_packed if Kp == K else jnp.pad(w_packed, ((0, Kp - K), (0, 0)))

    if single_k:
        grid = (nm,)
        dims = ("parallel",)
        in_specs = [pl.BlockSpec((TM, Kp), lambda i: (i, 0)),
                    pl.BlockSpec((Kp, Cp), lambda i: (0, 0))]
        out_specs = (pl.BlockSpec((TM, Cp), lambda i: (i, 0)),
                     pl.BlockSpec((1, 2, Cp), lambda i: (i, 0, 0)))
        scratch = []
    else:
        grid = (nm, nk)                          # K reduction axis last
        dims = ("parallel", "arbitrary")
        in_specs = [pl.BlockSpec((TM, tk), lambda i, k: (i, k)),
                    pl.BlockSpec((tk, Cp), lambda i, k: (k, 0))]
        out_specs = (pl.BlockSpec((TM, Cp), lambda i, k: (i, 0)),
                     pl.BlockSpec((1, 2, Cp), lambda i, k: (i, 0, 0)))
        scratch = [pltpu.VMEM((TM, Cp), jnp.float32)]

    cost = pl.CostEstimate(
        flops=2 * Mp * Kp * Cp, transcendentals=0,
        bytes_accessed=Mp * Kp * 2 + Kp * Cp * 2 + Mp * Cp * 2 + nm * 2 * Cp * 4)

    kernel = functools.partial(_conv_stats_kernel, single_k=single_k,
                               tm=TM, m_valid=M)
    y, stats = pl.pallas_call(
        kernel,
        out_shape=(jax.ShapeDtypeStruct((Mp, Cp), jnp.bfloat16),
                   jax.ShapeDtypeStruct((nm, 2, Cp), jnp.float32)),
        grid_spec=pltpu.PrefetchScalarGridSpec(
            num_scalar_prefetch=0, grid=grid,
            in_specs=in_specs, out_specs=out_specs,
            scratch_shapes=scratch),
        compiler_params=pltpu.CompilerParams(
            dimension_semantics=dims, vmem_limit_bytes=_VMEM_LIMIT),
        cost_estimate=cost,
    )(a, b)

    # Tiny cross-tile combine (Chan parallel-variance formula, f32, nm x Cp).
    counts = jnp.minimum(M - jnp.arange(nm) * TM, TM).astype(jnp.float32)
    sum_t, m2_t = stats[:, 0, :], stats[:, 1, :]
    mean = jnp.sum(sum_t, axis=0) / M
    delta = sum_t / counts[:, None] - mean[None, :]
    m2 = jnp.sum(m2_t, axis=0) + jnp.sum(counts[:, None] * delta * delta, axis=0)
    var = jnp.maximum(m2 / M, 0.0)                      # biased (train mode)
    scale = (gamma_p[0] * jax.lax.rsqrt(var + BN_EPS)).reshape(1, Cp)
    shift = (beta_p[0] - mean * scale[0]).reshape(1, Cp)

    has_res = residual is not None
    inputs = [y, scale, shift]
    in_specs2 = [pl.BlockSpec((TM, Cp), lambda i: (i, 0)),
                 pl.BlockSpec((1, Cp), lambda i: (0, 0)),
                 pl.BlockSpec((1, Cp), lambda i: (0, 0))]
    if has_res:
        r = residual.astype(jnp.bfloat16)               # bf16 residual read
        r = jnp.pad(r, ((0, Mp - M), (0, Cp - r.shape[1])))
        inputs.append(r)
        in_specs2.append(pl.BlockSpec((TM, Cp), lambda i: (i, 0)))

    out = pl.pallas_call(
        functools.partial(_bn_apply_kernel, relu=relu, has_res=has_res),
        out_shape=jax.ShapeDtypeStruct((Mp, Cp), jnp.bfloat16),
        grid_spec=pltpu.PrefetchScalarGridSpec(
            num_scalar_prefetch=0, grid=(nm,),
            in_specs=in_specs2,
            out_specs=pl.BlockSpec((TM, Cp), lambda i: (i, 0))),
        compiler_params=pltpu.CompilerParams(
            dimension_semantics=("parallel",), vmem_limit_bytes=_VMEM_LIMIT),
        cost_estimate=pl.CostEstimate(
            flops=3 * Mp * Cp, transcendentals=0,
            bytes_accessed=(4 + 2 * int(has_res)) * Mp * Cp + 8 * Cp),
    )(*inputs)

    return out[:M, :c_out]


# --------------------------------------------------------------------------
# Plain-JAX glue: im2col, conv wiring, parameter pre-packing, BasicBlock
# --------------------------------------------------------------------------
def im2col(x_nhwc, ksize, stride, padding):
    N, H, W, C = x_nhwc.shape
    if padding:
        x_nhwc = jnp.pad(
            x_nhwc, ((0, 0), (padding, padding), (padding, padding), (0, 0)))
    Ho = (H + 2 * padding - ksize) // stride + 1
    Wo = (W + 2 * padding - ksize) // stride + 1
    cols = []
    for dy in range(ksize):
        for dx in range(ksize):
            cols.append(x_nhwc[:, dy:dy + stride * Ho:stride,
                               dx:dx + stride * Wo:stride, :])
    patches = jnp.concatenate(cols, axis=-1)                 # [N,Ho,Wo,k*k*C]
    return patches.reshape(N * Ho * Wo, ksize * ksize * C), Ho, Wo


def conv_bn(x_nhwc, packed, stride, padding, relu, residual=None):
    N = x_nhwc.shape[0]
    patches, Ho, Wo = im2col(x_nhwc.astype(jnp.bfloat16),
                             packed['k'], stride, padding)
    res2d = None
    if residual is not None:
        res2d = residual.reshape(N * Ho * Wo, residual.shape[-1])
    y = conv_bn_pallas(patches, packed['w'], packed['g'], packed['b'],
                       packed['cout'], residual=res2d, relu=relu)
    return y.reshape(N, Ho, Wo, packed['cout'])


def _pack_conv_bn(w, gamma, beta):
    """One-time packing: [Cout,Cin,kh,kw] -> [kh*kw*Cin, Cp] bf16 (+ BN)."""
    cout, cin, kh, _ = w.shape
    cp = _round_up(cout, _LANE)                 # lane-dense MXU/output width
    w2 = jnp.transpose(w, (2, 3, 1, 0)).reshape(kh * kh * cin, cout)
    w2 = jnp.pad(w2, ((0, 0), (0, cp - cout))).astype(jnp.bfloat16)
    g = jnp.pad(gamma.astype(jnp.float32), (0, cp - cout)).reshape(1, cp)
    b = jnp.pad(beta.astype(jnp.float32), (0, cp - cout)).reshape(1, cp)
    return {'w': w2, 'g': g, 'b': b, 'cout': cout, 'k': kh}


def prepare_block_params(p):
    q = {'stride': p['stride'],
         'c1': _pack_conv_bn(p['w1'], p['g1'], p['b1']),
         'c2': _pack_conv_bn(p['w2'], p['g2'], p['b2'])}
    if 'ws' in p:
        q['cs'] = _pack_conv_bn(p['ws'], p['gs'], p['bs'])
    return q


def basic_block_forward(packed, x_nchw):
    """BasicBlock.forward: conv3x3+BN+ReLU -> conv3x3+BN, + shortcut, ReLU."""
    x = jnp.transpose(x_nchw.astype(jnp.float32), (0, 2, 3, 1))  # NCHW -> NHWC
    s = packed['stride']
    h = conv_bn(x, packed['c1'], stride=s, padding=1, relu=True)
    if 'cs' in packed:
        shortcut = conv_bn(x, packed['cs'], stride=s, padding=0, relu=False)
    else:
        shortcut = x
    out = conv_bn(h, packed['c2'], stride=1, padding=1, relu=True,
                  residual=shortcut)
    return jnp.transpose(out.astype(jnp.float32), (0, 3, 1, 2))  # NHWC -> NCHW


# --------------------------------------------------------------------------
# Parameters + pure-JAX reference (sanity check)
# --------------------------------------------------------------------------
def init_block_params(key, in_c, out_c, stride):
    keys = iter(jax.random.split(key, 16))

    def conv_w(cout, cin, k):
        fan_in = cin * k * k
        return jax.random.normal(next(keys), (cout, cin, k, k),
                                 jnp.float32) / jnp.sqrt(fan_in)

    def bn_p(c):
        g = 1.0 + 0.1 * jax.random.normal(next(keys), (c,), jnp.float32)
        b = 0.1 * jax.random.normal(next(keys), (c,), jnp.float32)
        return g, b

    p = {'stride': stride}
    p['w1'] = conv_w(out_c, in_c, 3)
    p['g1'], p['b1'] = bn_p(out_c)
    p['w2'] = conv_w(out_c, out_c, 3)
    p['g2'], p['b2'] = bn_p(out_c)
    if stride != 1 or in_c != out_c:
        p['ws'] = conv_w(out_c, in_c, 1)
        p['gs'], p['bs'] = bn_p(out_c)
    return p


def _ref_conv(x, w, stride, padding):
    return jax.lax.conv_general_dilated(
        x, w, window_strides=(stride, stride),
        padding=((padding, padding), (padding, padding)),
        dimension_numbers=('NCHW', 'OIHW', 'NCHW'))


def _ref_bn(y, gamma, beta):
    mean = jnp.mean(y, axis=(0, 2, 3), keepdims=True)
    var = jnp.var(y, axis=(0, 2, 3), keepdims=True)      # biased (train mode)
    return ((y - mean) * jax.lax.rsqrt(var + BN_EPS)
            * gamma.reshape(1, -1, 1, 1) + beta.reshape(1, -1, 1, 1))


def reference_forward(params, x):
    s = params['stride']
    h = jax.nn.relu(_ref_bn(_ref_conv(x, params['w1'], s, 1),
                            params['g1'], params['b1']))
    h = _ref_bn(_ref_conv(h, params['w2'], 1, 1), params['g2'], params['b2'])
    if 'ws' in params:
        sc = _ref_bn(_ref_conv(x, params['ws'], s, 0), params['gs'], params['bs'])
    else:
        sc = x
    return jax.nn.relu(h + sc)


# --------------------------------------------------------------------------
if __name__ == "__main__":
    key = jax.random.PRNGKey(0)
    k1, k2, k3, k4 = jax.random.split(key, 4)

    # Downsampling block: conv1x1 shortcut path (stride=2, 32 -> 64 channels).
    x_a = jax.random.normal(k1, (2, 32, 16, 16), jnp.float32)
    p_a = init_block_params(k2, 32, 64, 2)
    packed_a = prepare_block_params(p_a)
    out_a = jax.jit(functools.partial(basic_block_forward, packed_a))(x_a)
    jax.block_until_ready(out_a)
    assert out_a.shape == (2, 64, 8, 8)

    # Identity shortcut block (stride=1, channels unchanged).
    x_b = jax.random.normal(k3, (2, 64, 8, 8), jnp.float32)
    p_b = init_block_params(k4, 64, 64, 1)
    packed_b = prepare_block_params(p_b)
    out_b = jax.jit(functools.partial(basic_block_forward, packed_b))(x_b)
    jax.block_until_ready(out_b)
    assert out_b.shape == (2, 64, 8, 8)

    for out, p, x in ((out_a, p_a, x_a), (out_b, p_b, x_b)):
        assert bool(jnp.all(jnp.isfinite(out)))
        ref = reference_forward(p, x)
        rel = jnp.linalg.norm(out - ref) / (jnp.linalg.norm(ref) + 1e-6)
        assert float(rel) < 0.05, f"relative error too large: {float(rel)}"

    print("KERNEL_OK")
</pallas_src>

<mosaic_0001>
module attributes {stable_mosaic.version = 11 : i64} {
  func.func @_conv_stats_kernel(%arg0: i32, %arg1: memref<128x32xbf16, #tpu.memory_space<vmem>>, %arg2: memref<32x128xbf16, #tpu.memory_space<vmem>>, %arg3: memref<128x128xbf16, #tpu.memory_space<vmem>>, %arg4: memref<1x2x128xf32, #tpu.memory_space<vmem>>) attributes {dimension_semantics = [#tpu.dimension_semantics<parallel>], iteration_bounds = array<i64: 1>, scalar_prefetch = 0 : i64, scratch_operands = 0 : i64, tpu.core_type = #tpu.core_type<tc>, window_params = [{transform_indices = @transform_0, window_bounds = array<i64: 128, 32>}, {pipeline_mode = #tpu.pipeline_mode<synchronous>, transform_indices = @transform_1, window_bounds = array<i64: 32, 128>}, {transform_indices = @transform_2, window_bounds = array<i64: 128, 128>}, {transform_indices = @transform_3, window_bounds = array<i64: 1, 2, 128>}]} {
    %c0 = arith.constant 0 : index
    %c0_0 = arith.constant 0 : index
    %0 = vector.load %arg1[%c0, %c0_0] : memref<128x32xbf16, #tpu.memory_space<vmem>>, vector<128x32xbf16>
    %c0_1 = arith.constant 0 : index
    %c0_2 = arith.constant 0 : index
    %1 = vector.load %arg2[%c0_1, %c0_2] : memref<32x128xbf16, #tpu.memory_space<vmem>>, vector<32x128xbf16>
    %cst = arith.constant dense<0.000000e+00> : vector<128x128xf32>
    %2 = tpu.matmul %0, %1, %cst {dimension_numbers = #tpu.dot_dimension_numbers<[1], [0], [0], [1], [0, 0, 1, 1], [], []>} : vector<128x32xbf16>, vector<32x128xbf16>, vector<128x128xf32> -> vector<128x128xf32>
    %c128_i32 = arith.constant 128 : i32
    %3 = arith.muli %arg0, %c128_i32 : i32
    %c128_i32_3 = arith.constant 128 : i32
    %4 = arith.subi %c128_i32_3, %3 : i32
    %5 = tpu.iota {dimensions = array<i32: 0>} : vector<128x128xi32>
    %6 = vector.broadcast %4 : i32 to vector<128x128xi32>
    %7 = arith.cmpi slt, %5, %6 : vector<128x128xi32>
    %c128_i32_4 = arith.constant 128 : i32
    %8 = arith.minsi %4, %c128_i32_4 : i32
    %9 = arith.sitofp %8 : i32 to f32
    %cst_5 = arith.constant 1.000000e+00 : f32
    %10 = arith.divf %cst_5, %9 : f32
    %cst_6 = arith.constant 0.000000e+00 : f32
    %11 = vector.broadcast %cst_6 : f32 to vector<128x128xf32>
    %12 = arith.select %7, %2, %11 : vector<128x128xi1>, vector<128x128xf32>
    %cst_7 = arith.constant dense<0.000000e+00> : vector<128xf32>
    %13 = vector.multi_reduction <add>, %12, %cst_7 [0] : vector<128x128xf32> to vector<128xf32>
    %14 = vector.shape_cast %13 : vector<128xf32> to vector<1x128xf32>
    %15 = vector.broadcast %10 : f32 to vector<1x128xf32>
    %16 = arith.mulf %14, %15 : vector<1x128xf32>
    %17 = vector.broadcast %16 : vector<1x128xf32> to vector<128x128xf32>
    %18 = arith.subf %2, %17 : vector<128x128xf32>
    %cst_8 = arith.constant 0.000000e+00 : f32
    %19 = vector.broadcast %cst_8 : f32 to vector<128x128xf32>
    %20 = arith.select %7, %18, %19 : vector<128x128xi1>, vector<128x128xf32>
    %21 = arith.mulf %20, %20 : vector<128x128xf32>
    %cst_9 = arith.constant dense<0.000000e+00> : vector<128xf32>
    %22 = vector.multi_reduction <add>, %21, %cst_9 [0] : vector<128x128xf32> to vector<128xf32>
    %23 = vector.shape_cast %22 : vector<128xf32> to vector<1x128xf32>
    %24 = vector.shape_cast %14 : vector<1x128xf32> to vector<1x1x128xf32>
    %25 = vector.shape_cast %23 : vector<1x128xf32> to vector<1x1x128xf32>
    %26 = tpu.concatenate %24, %25 in 1 : vector<1x1x128xf32>, vector<1x1x128xf32> -> vector<1x2x128xf32>
    %c0_10 = arith.constant 0 : index
    %c0_11 = arith.constant 0 : index
    %c0_12 = arith.constant 0 : index
    %27 = vector.load %arg4[%c0_10, %c0_11, %c0_12] : memref<1x2x128xf32, #tpu.memory_space<vmem>>, vector<1x2x128xf32>
    tpu.vector_store %arg4[%c0_10, %c0_11, %c0_12], %26 {strides = array<i32>} : memref<1x2x128xf32, #tpu.memory_space<vmem>>, vector<1x2x128xf32>,
    %28 = arith.truncf %2 : vector<128x128xf32> to vector<128x128xbf16>
    %c0_13 = arith.constant 0 : index
    %c0_14 = arith.constant 0 : index
    %29 = vector.load %arg3[%c0_13, %c0_14] : memref<128x128xbf16, #tpu.memory_space<vmem>>, vector<128x128xbf16>
    tpu.vector_store %arg3[%c0_13, %c0_14], %28 {strides = array<i32>} : memref<128x128xbf16, #tpu.memory_space<vmem>>, vector<128x128xbf16>,
    return
  }
  func.func @transform_0(%arg0: i32) -> (i32, i32) {
    %c0_i32 = arith.constant 0 : i32
    %c0_i32_0 = arith.constant 0 : i32
    return %arg0, %c0_i32 : i32, i32
  }
  func.func @transform_1(%arg0: i32) -> (i32, i32) {
    %c0_i32 = arith.constant 0 : i32
    %c0_i32_0 = arith.constant 0 : i32
    %c0_i32_1 = arith.constant 0 : i32
    return %c0_i32, %c0_i32_0 : i32, i32
  }
  func.func @transform_2(%arg0: i32) -> (i32, i32) {
    %c0_i32 = arith.constant 0 : i32
    %c0_i32_0 = arith.constant 0 : i32
    return %arg0, %c0_i32 : i32, i32
  }
  func.func @transform_3(%arg0: i32) -> (i32, i32, i32) {
    %c0_i32 = arith.constant 0 : i32
    %c0_i32_0 = arith.constant 0 : i32
    %c0_i32_1 = arith.constant 0 : i32
    return %arg0, %c0_i32, %c0_i32_0 : i32, i32, i32
  }
}

module attributes {stable_mosaic.version = 11 : i64} {
  func.func @_bn_apply_kernel(%arg0: i32, %arg1: memref<128x128xbf16, #tpu.memory_space<vmem>>, %arg2: memref<1x128xf32, #tpu.memory_space<vmem>>, %arg3: memref<1x128xf32, #tpu.memory_space<vmem>>, %arg4: memref<128x128xbf16, #tpu.memory_space<vmem>>) attributes {dimension_semantics = [#tpu.dimension_semantics<parallel>], iteration_bounds = array<i64: 1>, scalar_prefetch = 0 : i64, scratch_operands = 0 : i64, tpu.core_type = #tpu.core_type<tc>, window_params = [{transform_indices = @transform_0, window_bounds = array<i64: 128, 128>}, {pipeline_mode = #tpu.pipeline_mode<synchronous>, transform_indices = @transform_1, window_bounds = array<i64: 1, 128>}, {pipeline_mode = #tpu.pipeline_mode<synchronous>, transform_indices = @transform_2, window_bounds = array<i64: 1, 128>}, {transform_indices = @transform_3, window_bounds = array<i64: 128, 128>}]} {
    %c0 = arith.constant 0 : index
    %c0_0 = arith.constant 0 : index
    %0 = vector.load %arg1[%c0, %c0_0] : memref<128x128xbf16, #tpu.memory_space<vmem>>, vector<128x128xbf16>
    %1 = arith.extf %0 : vector<128x128xbf16> to vector<128x128xf32>
    %c0_1 = arith.constant 0 : index
    %c0_2 = arith.constant 0 : index
    %2 = vector.load %arg2[%c0_1, %c0_2] : memref<1x128xf32, #tpu.memory_space<vmem>>, vector<1x128xf32>
    %3 = vector.broadcast %2 : vector<1x128xf32> to vector<128x128xf32>
    %4 = arith.mulf %1, %3 : vector<128x128xf32>
    %c0_3 = arith.constant 0 : index
    %c0_4 = arith.constant 0 : index
    %5 = vector.load %arg3[%c0_3, %c0_4] : memref<1x128xf32, #tpu.memory_space<vmem>>, vector<1x128xf32>
    %6 = vector.broadcast %5 : vector<1x128xf32> to vector<128x128xf32>
    %7 = arith.addf %4, %6 : vector<128x128xf32>
    %8 = arith.truncf %7 : vector<128x128xf32> to vector<128x128xbf16>
    %c0_5 = arith.constant 0 : index
    %c0_6 = arith.constant 0 : index
    %9 = vector.load %arg4[%c0_5, %c0_6] : memref<128x128xbf16, #tpu.memory_space<vmem>>, vector<128x128xbf16>
    tpu.vector_store %arg4[%c0_5, %c0_6], %8 {strides = array<i32>} : memref<128x128xbf16, #tpu.memory_space<vmem>>, vector<128x128xbf16>,
    return
  }
  func.func @transform_0(%arg0: i32) -> (i32, i32) {
    %c0_i32 = arith.constant 0 : i32
    %c0_i32_0 = arith.constant 0 : i32
    return %arg0, %c0_i32 : i32, i32
  }
  func.func @transform_1(%arg0: i32) -> (i32, i32) {
    %c0_i32 = arith.constant 0 : i32
    %c0_i32_0 = arith.constant 0 : i32
    %c0_i32_1 = arith.constant 0 : i32
    return %c0_i32, %c0_i32_0 : i32, i32
  }
  func.func @transform_2(%arg0: i32) -> (i32, i32) {
    %c0_i32 = arith.constant 0 : i32
    %c0_i32_0 = arith.constant 0 : i32
    %c0_i32_1 = arith.constant 0 : i32
    return %c0_i32, %c0_i32_0 : i32, i32
  }
  func.func @transform_3(%arg0: i32) -> (i32, i32) {
    %c0_i32 = arith.constant 0 : i32
    %c0_i32_0 = arith.constant 0 : i32
    return %arg0, %c0_i32 : i32, i32
  }
}

module attributes {stable_mosaic.version = 11 : i64} {
  func.func @_bn_apply_kernel(%arg0: i32, %arg1: memref<128x128xbf16, #tpu.memory_space<vmem>>, %arg2: memref<1x128xf32, #tpu.memory_space<vmem>>, %arg3: memref<1x128xf32, #tpu.memory_space<vmem>>, %arg4: memref<128x128xbf16, #tpu.memory_space<vmem>>) attributes {dimension_semantics = [#tpu.dimension_semantics<parallel>], iteration_bounds = array<i64: 1>, scalar_prefetch = 0 : i64, scratch_operands = 0 : i64, tpu.core_type = #tpu.core_type<tc>, window_params = [{transform_indices = @transform_0, window_bounds = array<i64: 128, 128>}, {pipeline_mode = #tpu.pipeline_mode<synchronous>, transform_indices = @transform_1, window_bounds = array<i64: 1, 128>}, {pipeline_mode = #tpu.pipeline_mode<synchronous>, transform_indices = @transform_2, window_bounds = array<i64: 1, 128>}, {transform_indices = @transform_3, window_bounds = array<i64: 128, 128>}]} {
    %c0 = arith.constant 0 : index
    %c0_0 = arith.constant 0 : index
    %0 = vector.load %arg1[%c0, %c0_0] : memref<128x128xbf16, #tpu.memory_space<vmem>>, vector<128x128xbf16>
    %1 = arith.extf %0 : vector<128x128xbf16> to vector<128x128xf32>
    %c0_1 = arith.constant 0 : index
    %c0_2 = arith.constant 0 : index
    %2 = vector.load %arg2[%c0_1, %c0_2] : memref<1x128xf32, #tpu.memory_space<vmem>>, vector<1x128xf32>
    %3 = vector.broadcast %2 : vector<1x128xf32> to vector<128x128xf32>
    %4 = arith.mulf %1, %3 : vector<128x128xf32>
    %c0_3 = arith.constant 0 : index
    %c0_4 = arith.constant 0 : index
    %5 = vector.load %arg3[%c0_3, %c0_4] : memref<1x128xf32, #tpu.memory_space<vmem>>, vector<1x128xf32>
    %6 = vector.broadcast %5 : vector<1x128xf32> to vector<128x128xf32>
    %7 = arith.addf %4, %6 : vector<128x128xf32>
    %cst = arith.constant 0.000000e+00 : f32
    %8 = vector.broadcast %cst : f32 to vector<128x128xf32>
    %9 = arith.maximumf %7, %8 : vector<128x128xf32>
    %10 = arith.truncf %9 : vector<128x128xf32> to vector<128x128xbf16>
    %c0_5 = arith.constant 0 : index
    %c0_6 = arith.constant 0 : index
    %11 = vector.load %arg4[%c0_5, %c0_6] : memref<128x128xbf16, #tpu.memory_space<vmem>>, vector<128x128xbf16>
    tpu.vector_store %arg4[%c0_5, %c0_6], %10 {strides = array<i32>} : memref<128x128xbf16, #tpu.memory_space<vmem>>, vector<128x128xbf16>,
    return
  }
  func.func @transform_0(%arg0: i32) -> (i32, i32) {
    %c0_i32 = arith.constant 0 : i32
    %c0_i32_0 = arith.constant 0 : i32
    return %arg0, %c0_i32 : i32, i32
  }
  func.func @transform_1(%arg0: i32) -> (i32, i32) {
    %c0_i32 = arith.constant 0 : i32
    %c0_i32_0 = arith.constant 0 : i32
    %c0_i32_1 = arith.constant 0 : i32
    return %c0_i32, %c0_i32_0 : i32, i32
  }
  func.func @transform_2(%arg0: i32) -> (i32, i32) {
    %c0_i32 = arith.constant 0 : i32
    %c0_i32_0 = arith.constant 0 : i32
    %c0_i32_1 = arith.constant 0 : i32
    return %c0_i32, %c0_i32_0 : i32, i32
  }
  func.func @transform_3(%arg0: i32) -> (i32, i32) {
    %c0_i32 = arith.constant 0 : i32
    %c0_i32_0 = arith.constant 0 : i32
    return %arg0, %c0_i32 : i32, i32
  }
}

module attributes {stable_mosaic.version = 11 : i64} {
  func.func @_conv_stats_kernel(%arg0: i32, %arg1: memref<128x288xbf16, #tpu.memory_space<vmem>>, %arg2: memref<288x128xbf16, #tpu.memory_space<vmem>>, %arg3: memref<128x128xbf16, #tpu.memory_space<vmem>>, %arg4: memref<1x2x128xf32, #tpu.memory_space<vmem>>) attributes {dimension_semantics = [#tpu.dimension_semantics<parallel>], iteration_bounds = array<i64: 1>, scalar_prefetch = 0 : i64, scratch_operands = 0 : i64, tpu.core_type = #tpu.core_type<tc>, window_params = [{transform_indices = @transform_0, window_bounds = array<i64: 128, 288>}, {pipeline_mode = #tpu.pipeline_mode<synchronous>, transform_indices = @transform_1, window_bounds = array<i64: 288, 128>}, {transform_indices = @transform_2, window_bounds = array<i64: 128, 128>}, {transform_indices = @transform_3, window_bounds = array<i64: 1, 2, 128>}]} {
    %c0 = arith.constant 0 : index
    %c0_0 = arith.constant 0 : index
    %0 = vector.load %arg1[%c0, %c0_0] : memref<128x288xbf16, #tpu.memory_space<vmem>>, vector<128x288xbf16>
    %c0_1 = arith.constant 0 : index
    %c0_2 = arith.constant 0 : index
    %1 = vector.load %arg2[%c0_1, %c0_2] : memref<288x128xbf16, #tpu.memory_space<vmem>>, vector<288x128xbf16>
    %cst = arith.constant dense<0.000000e+00> : vector<128x128xf32>
    %2 = tpu.matmul %0, %1, %cst {dimension_numbers = #tpu.dot_dimension_numbers<[1], [0], [0], [1], [0, 0, 1, 1], [], []>} : vector<128x288xbf16>, vector<288x128xbf16>, vector<128x128xf32> -> vector<128x128xf32>
    %c128_i32 = arith.constant 128 : i32
    %3 = arith.muli %arg0, %c128_i32 : i32
    %c128_i32_3 = arith.constant 128 : i32
    %4 = arith.subi %c128_i32_3, %3 : i32
    %5 = tpu.iota {dimensions = array<i32: 0>} : vector<128x128xi32>
    %6 = vector.broadcast %4 : i32 to vector<128x128xi32>
    %7 = arith.cmpi slt, %5, %6 : vector<128x128xi32>
    %c128_i32_4 = arith.constant 128 : i32
    %8 = arith.minsi %4, %c128_i32_4 : i32
    %9 = arith.sitofp %8 : i32 to f32
    %cst_5 = arith.constant 1.000000e+00 : f32
    %10 = arith.divf %cst_5, %9 : f32
    %cst_6 = arith.constant 0.000000e+00 : f32
    %11 = vector.broadcast %cst_6 : f32 to vector<128x128xf32>
    %12 = arith.select %7, %2, %11 : vector<128x128xi1>, vector<128x128xf32>
    %cst_7 = arith.constant dense<0.000000e+00> : vector<128xf32>
    %13 = vector.multi_reduction <add>, %12, %cst_7 [0] : vector<128x128xf32> to vector<128xf32>
    %14 = vector.shape_cast %13 : vector<128xf32> to vector<1x128xf32>
    %15 = vector.broadcast %10 : f32 to vector<1x128xf32>
    %16 = arith.mulf %14, %15 : vector<1x128xf32>
    %17 = vector.broadcast %16 : vector<1x128xf32> to vector<128x128xf32>
    %18 = arith.subf %2, %17 : vector<128x128xf32>
    %cst_8 = arith.constant 0.000000e+00 : f32
    %19 = vector.broadcast %cst_8 : f32 to vector<128x128xf32>
    %20 = arith.select %7, %18, %19 : vector<128x128xi1>, vector<128x128xf32>
    %21 = arith.mulf %20, %20 : vector<128x128xf32>
    %cst_9 = arith.constant dense<0.000000e+00> : vector<128xf32>
    %22 = vector.multi_reduction <add>, %21, %cst_9 [0] : vector<128x128xf32> to vector<128xf32>
    %23 = vector.shape_cast %22 : vector<128xf32> to vector<1x128xf32>
    %24 = vector.shape_cast %14 : vector<1x128xf32> to vector<1x1x128xf32>
    %25 = vector.shape_cast %23 : vector<1x128xf32> to vector<1x1x128xf32>
    %26 = tpu.concatenate %24, %25 in 1 : vector<1x1x128xf32>, vector<1x1x128xf32> -> vector<1x2x128xf32>
    %c0_10 = arith.constant 0 : index
    %c0_11 = arith.constant 0 : index
    %c0_12 = arith.constant 0 : index
    %27 = vector.load %arg4[%c0_10, %c0_11, %c0_12] : memref<1x2x128xf32, #tpu.memory_space<vmem>>, vector<1x2x128xf32>
    tpu.vector_store %arg4[%c0_10, %c0_11, %c0_12], %26 {strides = array<i32>} : memref<1x2x128xf32, #tpu.memory_space<vmem>>, vector<1x2x128xf32>,
    %28 = arith.truncf %2 : vector<128x128xf32> to vector<128x128xbf16>
    %c0_13 = arith.constant 0 : index
    %c0_14 = arith.constant 0 : index
    %29 = vector.load %arg3[%c0_13, %c0_14] : memref<128x128xbf16, #tpu.memory_space<vmem>>, vector<128x128xbf16>
    tpu.vector_store %arg3[%c0_13, %c0_14], %28 {strides = array<i32>} : memref<128x128xbf16, #tpu.memory_space<vmem>>, vector<128x128xbf16>,
    return
  }
  func.func @transform_0(%arg0: i32) -> (i32, i32) {
    %c0_i32 = arith.constant 0 : i32
    %c0_i32_0 = arith.constant 0 : i32
    return %arg0, %c0_i32 : i32, i32
  }
  func.func @transform_1(%arg0: i32) -> (i32, i32) {
    %c0_i32 = arith.constant 0 : i32
    %c0_i32_0 = arith.constant 0 : i32
    %c0_i32_1 = arith.constant 0 : i32
    return %c0_i32, %c0_i32_0 : i32, i32
  }
  func.func @transform_2(%arg0: i32) -> (i32, i32) {
    %c0_i32 = arith.constant 0 : i32
    %c0_i32_0 = arith.constant 0 : i32
    return %arg0, %c0_i32 : i32, i32
  }
  func.func @transform_3(%arg0: i32) -> (i32, i32, i32) {
    %c0_i32 = arith.constant 0 : i32
    %c0_i32_0 = arith.constant 0 : i32
    %c0_i32_1 = arith.constant 0 : i32
    return %arg0, %c0_i32, %c0_i32_0 : i32, i32, i32
  }
}

module attributes {stable_mosaic.version = 11 : i64} {
  func.func @_conv_stats_kernel(%arg0: i32, %arg1: memref<128x576xbf16, #tpu.memory_space<vmem>>, %arg2: memref<576x128xbf16, #tpu.memory_space<vmem>>, %arg3: memref<128x128xbf16, #tpu.memory_space<vmem>>, %arg4: memref<1x2x128xf32, #tpu.memory_space<vmem>>) attributes {dimension_semantics = [#tpu.dimension_semantics<parallel>], iteration_bounds = array<i64: 1>, scalar_prefetch = 0 : i64, scratch_operands = 0 : i64, tpu.core_type = #tpu.core_type<tc>, window_params = [{transform_indices = @transform_0, window_bounds = array<i64: 128, 576>}, {pipeline_mode = #tpu.pipeline_mode<synchronous>, transform_indices = @transform_1, window_bounds = array<i64: 576, 128>}, {transform_indices = @transform_2, window_bounds = array<i64: 128, 128>}, {transform_indices = @transform_3, window_bounds = array<i64: 1, 2, 128>}]} {
    %c0 = arith.constant 0 : index
    %c0_0 = arith.constant 0 : index
    %0 = vector.load %arg1[%c0, %c0_0] : memref<128x576xbf16, #tpu.memory_space<vmem>>, vector<128x576xbf16>
    %c0_1 = arith.constant 0 : index
    %c0_2 = arith.constant 0 : index
    %1 = vector.load %arg2[%c0_1, %c0_2] : memref<576x128xbf16, #tpu.memory_space<vmem>>, vector<576x128xbf16>
    %cst = arith.constant dense<0.000000e+00> : vector<128x128xf32>
    %2 = tpu.matmul %0, %1, %cst {dimension_numbers = #tpu.dot_dimension_numbers<[1], [0], [0], [1], [0, 0, 1, 1], [], []>} : vector<128x576xbf16>, vector<576x128xbf16>, vector<128x128xf32> -> vector<128x128xf32>
    %c128_i32 = arith.constant 128 : i32
    %3 = arith.muli %arg0, %c128_i32 : i32
    %c128_i32_3 = arith.constant 128 : i32
    %4 = arith.subi %c128_i32_3, %3 : i32
    %5 = tpu.iota {dimensions = array<i32: 0>} : vector<128x128xi32>
    %6 = vector.broadcast %4 : i32 to vector<128x128xi32>
    %7 = arith.cmpi slt, %5, %6 : vector<128x128xi32>
    %c128_i32_4 = arith.constant 128 : i32
    %8 = arith.minsi %4, %c128_i32_4 : i32
    %9 = arith.sitofp %8 : i32 to f32
    %cst_5 = arith.constant 1.000000e+00 : f32
    %10 = arith.divf %cst_5, %9 : f32
    %cst_6 = arith.constant 0.000000e+00 : f32
    %11 = vector.broadcast %cst_6 : f32 to vector<128x128xf32>
    %12 = arith.select %7, %2, %11 : vector<128x128xi1>, vector<128x128xf32>
    %cst_7 = arith.constant dense<0.000000e+00> : vector<128xf32>
    %13 = vector.multi_reduction <add>, %12, %cst_7 [0] : vector<128x128xf32> to vector<128xf32>
    %14 = vector.shape_cast %13 : vector<128xf32> to vector<1x128xf32>
    %15 = vector.broadcast %10 : f32 to vector<1x128xf32>
    %16 = arith.mulf %14, %15 : vector<1x128xf32>
    %17 = vector.broadcast %16 : vector<1x128xf32> to vector<128x128xf32>
    %18 = arith.subf %2, %17 : vector<128x128xf32>
    %cst_8 = arith.constant 0.000000e+00 : f32
    %19 = vector.broadcast %cst_8 : f32 to vector<128x128xf32>
    %20 = arith.select %7, %18, %19 : vector<128x128xi1>, vector<128x128xf32>
    %21 = arith.mulf %20, %20 : vector<128x128xf32>
    %cst_9 = arith.constant dense<0.000000e+00> : vector<128xf32>
    %22 = vector.multi_reduction <add>, %21, %cst_9 [0] : vector<128x128xf32> to vector<128xf32>
    %23 = vector.shape_cast %22 : vector<128xf32> to vector<1x128xf32>
    %24 = vector.shape_cast %14 : vector<1x128xf32> to vector<1x1x128xf32>
    %25 = vector.shape_cast %23 : vector<1x128xf32> to vector<1x1x128xf32>
    %26 = tpu.concatenate %24, %25 in 1 : vector<1x1x128xf32>, vector<1x1x128xf32> -> vector<1x2x128xf32>
    %c0_10 = arith.constant 0 : index
    %c0_11 = arith.constant 0 : index
    %c0_12 = arith.constant 0 : index
    %27 = vector.load %arg4[%c0_10, %c0_11, %c0_12] : memref<1x2x128xf32, #tpu.memory_space<vmem>>, vector<1x2x128xf32>
    tpu.vector_store %arg4[%c0_10, %c0_11, %c0_12], %26 {strides = array<i32>} : memref<1x2x128xf32, #tpu.memory_space<vmem>>, vector<1x2x128xf32>,
    %28 = arith.truncf %2 : vector<128x128xf32> to vector<128x128xbf16>
    %c0_13 = arith.constant 0 : index
    %c0_14 = arith.constant 0 : index
    %29 = vector.load %arg3[%c0_13, %c0_14] : memref<128x128xbf16, #tpu.memory_space<vmem>>, vector<128x128xbf16>
    tpu.vector_store %arg3[%c0_13, %c0_14], %28 {strides = array<i32>} : memref<128x128xbf16, #tpu.memory_space<vmem>>, vector<128x128xbf16>,
    return
  }
  func.func @transform_0(%arg0: i32) -> (i32, i32) {
    %c0_i32 = arith.constant 0 : i32
    %c0_i32_0 = arith.constant 0 : i32
    return %arg0, %c0_i32 : i32, i32
  }
  func.func @transform_1(%arg0: i32) -> (i32, i32) {
    %c0_i32 = arith.constant 0 : i32
    %c0_i32_0 = arith.constant 0 : i32
    %c0_i32_1 = arith.constant 0 : i32
    return %c0_i32, %c0_i32_0 : i32, i32
  }
  func.func @transform_2(%arg0: i32) -> (i32, i32) {
    %c0_i32 = arith.constant 0 : i32
    %c0_i32_0 = arith.constant 0 : i32
    return %arg0, %c0_i32 : i32, i32
  }
  func.func @transform_3(%arg0: i32) -> (i32, i32, i32) {
    %c0_i32 = arith.constant 0 : i32
    %c0_i32_0 = arith.constant 0 : i32
    %c0_i32_1 = arith.constant 0 : i32
    return %arg0, %c0_i32, %c0_i32_0 : i32, i32, i32
  }
}

module attributes {stable_mosaic.version = 11 : i64} {
  func.func @_bn_apply_kernel(%arg0: i32, %arg1: memref<128x128xbf16, #tpu.memory_space<vmem>>, %arg2: memref<1x128xf32, #tpu.memory_space<vmem>>, %arg3: memref<1x128xf32, #tpu.memory_space<vmem>>, %arg4: memref<128x128xbf16, #tpu.memory_space<vmem>>, %arg5: memref<128x128xbf16, #tpu.memory_space<vmem>>) attributes {dimension_semantics = [#tpu.dimension_semantics<parallel>], iteration_bounds = array<i64: 1>, scalar_prefetch = 0 : i64, scratch_operands = 0 : i64, tpu.core_type = #tpu.core_type<tc>, window_params = [{transform_indices = @transform_0, window_bounds = array<i64: 128, 128>}, {pipeline_mode = #tpu.pipeline_mode<synchronous>, transform_indices = @transform_1, window_bounds = array<i64: 1, 128>}, {pipeline_mode = #tpu.pipeline_mode<synchronous>, transform_indices = @transform_2, window_bounds = array<i64: 1, 128>}, {transform_indices = @transform_3, window_bounds = array<i64: 128, 128>}, {transform_indices = @transform_4, window_bounds = array<i64: 128, 128>}]} {
    %c0 = arith.constant 0 : index
    %c0_0 = arith.constant 0 : index
    %0 = vector.load %arg1[%c0, %c0_0] : memref<128x128xbf16, #tpu.memory_space<vmem>>, vector<128x128xbf16>
    %1 = arith.extf %0 : vector<128x128xbf16> to vector<128x128xf32>
    %c0_1 = arith.constant 0 : index
    %c0_2 = arith.constant 0 : index
    %2 = vector.load %arg2[%c0_1, %c0_2] : memref<1x128xf32, #tpu.memory_space<vmem>>, vector<1x128xf32>
    %3 = vector.broadcast %2 : vector<1x128xf32> to vector<128x128xf32>
    %4 = arith.mulf %1, %3 : vector<128x128xf32>
    %c0_3 = arith.constant 0 : index
    %c0_4 = arith.constant 0 : index
    %5 = vector.load %arg3[%c0_3, %c0_4] : memref<1x128xf32, #tpu.memory_space<vmem>>, vector<1x128xf32>
    %6 = vector.broadcast %5 : vector<1x128xf32> to vector<128x128xf32>
    %7 = arith.addf %4, %6 : vector<128x128xf32>
    %c0_5 = arith.constant 0 : index
    %c0_6 = arith.constant 0 : index
    %8 = vector.load %arg4[%c0_5, %c0_6] : memref<128x128xbf16, #tpu.memory_space<vmem>>, vector<128x128xbf16>
    %9 = arith.extf %8 : vector<128x128xbf16> to vector<128x128xf32>
    %10 = arith.addf %7, %9 : vector<128x128xf32>
    %cst = arith.constant 0.000000e+00 : f32
    %11 = vector.broadcast %cst : f32 to vector<128x128xf32>
    %12 = arith.maximumf %10, %11 : vector<128x128xf32>
    %13 = arith.truncf %12 : vector<128x128xf32> to vector<128x128xbf16>
    %c0_7 = arith.constant 0 : index
    %c0_8 = arith.constant 0 : index
    %14 = vector.load %arg5[%c0_7, %c0_8] : memref<128x128xbf16, #tpu.memory_space<vmem>>, vector<128x128xbf16>
    tpu.vector_store %arg5[%c0_7, %c0_8], %13 {strides = array<i32>} : memref<128x128xbf16, #tpu.memory_space<vmem>>, vector<128x128xbf16>,
    return
  }
  func.func @transform_0(%arg0: i32) -> (i32, i32) {
    %c0_i32 = arith.constant 0 : i32
    %c0_i32_0 = arith.constant 0 : i32
    return %arg0, %c0_i32 : i32, i32
  }
  func.func @transform_1(%arg0: i32) -> (i32, i32) {
    %c0_i32 = arith.constant 0 : i32
    %c0_i32_0 = arith.constant 0 : i32
    %c0_i32_1 = arith.constant 0 : i32
    return %c0_i32, %c0_i32_0 : i32, i32
  }
  func.func @transform_2(%arg0: i32) -> (i32, i32) {
    %c0_i32 = arith.constant 0 : i32
    %c0_i32_0 = arith.constant 0 : i32
    %c0_i32_1 = arith.constant 0 : i32
    return %c0_i32, %c0_i32_0 : i32, i32
  }
  func.func @transform_3(%arg0: i32) -> (i32, i32) {
    %c0_i32 = arith.constant 0 : i32
    %c0_i32_0 = arith.constant 0 : i32
    return %arg0, %c0_i32 : i32, i32
  }
  func.func @transform_4(%arg0: i32) -> (i32, i32) {
    %c0_i32 = arith.constant 0 : i32
    %c0_i32_0 = arith.constant 0 : i32
    return %arg0, %c0_i32 : i32, i32
  }
}

</mosaic_0001>

<bundles_post_ra>
// kernel: basic_block_forward.9
= control target key start
LH: loop header
LB: loop body
LE: loop exit
PB: predicated region body
PF: predicated region fallthrough
CT: control target
= control target key end

     0   :  { %s370_s0 = inlined_call_operand.vmem [shape: bf16[128,128], index: 0, kind: input, shape index: {}]   ;;  %s371_s1 = inlined_call_operand.vmem [shape: f32[1,128], index: 1, kind: input, shape index: {}]   ;;  %s372_s2 = inlined_call_operand.vmem [shape: f32[1,128], index: 2, kind: input, shape index: {}]   ;;  %s373_s3 = inlined_call_operand.vmem [shape: bf16[128,128], index: 3, kind: output, shape index: {}]  }
   0x1   :  { %v211_v0 = vld [vmem:[%s370_s0] sm:$0xff]   ;;  %v282_v4 = vld [vmem:[%s370_s0 + $0x8] sm:$0xff]   ;;  %v283_v5 = vld [vmem:[%s370_s0 + $0x10] sm:$0xff]  }
   0x2   :  { %v176_v1 = vld [vmem:[%s371_s1] ss:$0 sm:$0xff]  ;;  %v212_v2 = vunpack.c.l.bf16 %v211_v0  ;;  %v213_v3 = vunpack.c.h.bf16 %v211_v0  ;;  %v284_v6 = vld [vmem:[%s370_s0 + $0x18] sm:$0xff]   ;;  %v216_v8 = vunpack.c.l.bf16 %v282_v4  ;;  %v217_v9 = vunpack.c.h.bf16 %v282_v4  ;;  %v286_v25 = vld [vmem:[%s370_s0 + $0x28] sm:$0xff]  }
   0x3   :  { %v177_v7 = vld [vmem:[%s372_s2] ss:$0 sm:$0xff]  ;;  %v220_v10 = vunpack.c.l.bf16 %v283_v5  ;;  %v221_v11 = vunpack.c.h.bf16 %v283_v5  ;;  %v224_v14 = vunpack.c.l.bf16 %v284_v6  ;;  %v225_v15 = vunpack.c.h.bf16 %v284_v6  ;;  %v287_v30 = vld [vmem:[%s370_s0 + $0x30] sm:$0xff]   ;;  %v288_v35 = vld [vmem:[%s370_s0 + $0x38] sm:$0xff]  }
   0x4   :  { %v53_v12 = vmul.f32 %v212_v2, %v176_v1  ;;  %v54_v13 = vmul.f32 %v213_v3, %v176_v1  ;;  %v55_v16 = vmul.f32 %v216_v8, %v176_v1  ;;  %v56_v17 = vmul.f32 %v217_v9, %v176_v1  ;;  %v285_v20 = vld [vmem:[%s370_s0 + $0x20] sm:$0xff]  }
   0x5   :  { %v57_v18 = vmul.f32 %v220_v10, %v176_v1  ;;  %v58_v19 = vmul.f32 %v221_v11, %v176_v1  ;;  %v59_v23 = vmul.f32 %v224_v14, %v176_v1  ;;  %v60_v24 = vmul.f32 %v225_v15, %v176_v1 }
   0x6   :  { %v76_v21 = vadd.f32 %v177_v7, %v53_v12  ;;  %v77_v22 = vadd.f32 %v177_v7, %v54_v13  ;;  %v78_v26 = vadd.f32 %v177_v7, %v55_v16  ;;  %v79_v27 = vadd.f32 %v177_v7, %v56_v17 }
   0x7   :  { %v80_v28 = vadd.f32 %v177_v7, %v57_v18  ;;  %v81_v29 = vadd.f32 %v177_v7, %v58_v19  ;;  %v82_v32 = vadd.f32 %v177_v7, %v59_v23  ;;  %v83_v33 = vadd.f32 %v177_v7, %v60_v24 }
   0x8   :  { %v245_v31 = vpack.c.bf16 %v77_v22, %v76_v21  ;;  %v228_v34 = vunpack.c.l.bf16 %v285_v20  ;;  %v250_v36 = vpack.c.bf16 %v79_v27, %v78_v26  ;;  %v229_v38 = vunpack.c.h.bf16 %v285_v20 }
   0x9   :  { %v255_v37 = vpack.c.bf16 %v81_v29, %v80_v28  ;;  %v232_v39 = vunpack.c.l.bf16 %v286_v25  ;;  %v260_v40 = vpack.c.bf16 %v83_v33, %v82_v32  ;;  %v233_v42 = vunpack.c.h.bf16 %v286_v25 }
   0xa   :  { %246 = vst [vmem:[%s373_s3] sm:$0xff] %v245_v31   ;;  %v61_v41 = vmul.f32 %v228_v34, %v176_v1  ;;  %v236_v43 = vunpack.c.l.bf16 %v287_v30  ;;  %289 = vst [vmem:[%s373_s3 + $0x8] sm:$0xff] %v250_v36   ;;  %v62_v44 = vmul.f32 %v229_v38, %v176_v1  ;;  %v237_v46 = vunpack.c.h.bf16 %v287_v30 }
   0xb   :  { %290 = vst [vmem:[%s373_s3 + $0x10] sm:$0xff] %v255_v37   ;;  %v63_v45 = vmul.f32 %v232_v39, %v176_v1  ;;  %v240_v47 = vunpack.c.l.bf16 %v288_v35  ;;  %291 = vst [vmem:[%s373_s3 + $0x18] sm:$0xff] %v260_v40   ;;  %v64_v49 = vmul.f32 %v233_v42, %v176_v1  ;;  %v241_v51 = vunpack.c.h.bf16 %v288_v35 }
   0xc   :  { %v84_v48 = vadd.f32 %v177_v7, %v61_v41  ;;  %v65_v50 = vmul.f32 %v236_v43, %v176_v1  ;;  %v85_v52 = vadd.f32 %v177_v7, %v62_v44  ;;  %v66_v54 = vmul.f32 %v237_v46, %v176_v1 }
   0xd   :  { %v86_v53 = vadd.f32 %v177_v7, %v63_v45  ;;  %v67_v55 = vmul.f32 %v240_v47, %v176_v1  ;;  %v87_v56 = vadd.f32 %v177_v7, %v64_v49  ;;  %v68_v58 = vmul.f32 %v241_v51, %v176_v1 }
   0xe   :  { %v88_v57 = vadd.f32 %v177_v7, %v65_v50  ;;  %v265_v59 = vpack.c.bf16 %v85_v52, %v84_v48  ;;  %v89_v60 = vadd.f32 %v177_v7, %v66_v54 }
   0xf   :  { %v90_v61 = vadd.f32 %v177_v7, %v67_v55  ;;  %v270_v62 = vpack.c.bf16 %v87_v56, %v86_v53  ;;  %v91_v63 = vadd.f32 %v177_v7, %v68_v58 }
  0x10   :  { %292 = vst [vmem:[%s373_s3 + $0x20] sm:$0xff] %v265_v59   ;;  %v275_v0 = vpack.c.bf16 %v89_v60, %v88_v57 }
  0x11   :  { %293 = vst [vmem:[%s373_s3 + $0x28] sm:$0xff] %v270_v62   ;;  %v280_v2 = vpack.c.bf16 %v91_v63, %v90_v61 }
  0x12   :  { %294 = vst [vmem:[%s373_s3 + $0x30] sm:$0xff] %v275_v0  }
  0x13   :  { %295 = vst [vmem:[%s373_s3 + $0x38] sm:$0xff] %v280_v2  }

// kernel: basic_block_forward.8
= control target key start
LH: loop header
LB: loop body
LE: loop exit
PB: predicated region body
PF: predicated region fallthrough
CT: control target
= control target key end

     0   :  { %vm86_vm0 = vcmask 261120   ;;  %vm358_vm1 = vcmask 1040384   ;;  %s680_s1 = inlined_call_operand.vmem [shape: bf16[32,128], index: 1, kind: input, shape index: {}]   ;;  %s681_s0 = inlined_call_operand.vmem [shape: bf16[128,32], index: 0, kind: input, shape index: {}]   ;;  %s682_s2 = inlined_call_operand.vmem [shape: bf16[128,128], index: 2, kind: output, shape index: {0}]   ;;  %s683_s3 = inlined_call_operand.vmem [shape: f32[1,2,128], index: 3, kind: output, shape index: {1}]  }
   0x1   :  { %v580_v0 = vld [vmem:[%s680_s1] sm:$0xff]   ;;  %v581_v1 = vld [vmem:[%s680_s1 + $0x8] sm:$0xff]   ;;  %v584_v4 = vld [vmem:[%s681_s0 + $0x10] sm:$0xff]  }
   0x2   :  { %556 = vmatprep.subr.bf16.mxu0 %v580_v0  ;;  %v582_v2 = vld [vmem:[%s681_s0] sm:$0xff]   ;;  %576 = vmatprep.subr.bf16.mxu1 %v580_v0  ;;  %v583_v3 = vld [vmem:[%s681_s0 + $0x8] sm:$0xff]   ;;  %v588_v7 = vld [vmem:[%s681_s0 + $0x30] sm:$0xff]  }
   0x3   :  { %557 = vmatpush3.bf16.msra.mxu0 %v580_v0  ;;  %578 = vmatpush3.bf16.msra.mxu1 %v580_v0  ;;  %v586_v5 = vld [vmem:[%s681_s0 + $0x20] sm:$0xff]   ;;  %v587_v6 = vld [vmem:[%s681_s0 + $0x28] sm:$0xff]   ;;  %v585_v8 = vld [vmem:[%s681_s0 + $0x18] sm:$0xff]  }
   0x4   :  { %558 = vmatprep.subr.bf16.mxu0 %v581_v1  ;;  %560 = vmatprep.mubr.msk.bf16.mxu0 %vm86_vm0, %v582_v2  ;;  %v589_v9 = vld [vmem:[%s681_s0 + $0x38] sm:$0xff]  }
   0x5   :  { %577 = vmatprep.subr.bf16.mxu1 %v581_v1  ;;  %568 = vmatprep.mubr.msk.bf16.mxu1 %vm86_vm0, %v586_v5 }
   0x7   :  { %559 = vmatpush3.bf16.msra.mxu0 %v581_v1  ;;  %579 = vmatpush3.bf16.msra.mxu1 %v581_v1 }
   0xa   :  { %561 = vmatmul.mubr.msk.bf16.vlgmr.msra.gmra.mrb[0].mxu0 %vm86_vm0, %v583_v3  ;;  %569 = vmatmul.mubr.msk.bf16.vlgmr.msra.gmra.mrb[0].mxu1 %vm86_vm0, %v587_v6 }
   0xb   :  { %564 = vmatprep.mubr.msk.bf16.mxu0 %vm86_vm0, %v584_v4  ;;  %572 = vmatprep.mubr.msk.bf16.mxu1 %vm86_vm0, %v588_v7 }
  0x12   :  { %565 = vmatmul.mubr.msk.bf16.gmra.mrb[4].mxu0 %vm86_vm0, %v585_v8  ;;  %573 = vmatmul.mubr.msk.bf16.gmra.mrb[4].mxu1 %vm86_vm0, %v589_v9 }
  0xdd   :  { %v562_v10 = vpop.f32.mrb[0].mxu0  ;;  %v648_v11 = vpop.f32.mrb[0].mxu1 }
  0xde   :  { %v145_v12 = vpop.f32.mrb[1].mxu0  ;;  %v177_v13 = vpop.f32.mrb[1].mxu1 }
  0xdf   :  { %v563_v14 = vpop.f32.mrb[2].mxu0  ;;  %v571_v15 = vpop.f32.mrb[2].mxu1 }
  0xe0   :  { %v507_v16 = vpack.c.bf16 %v563_v14, %v562_v10  ;;  %v148_v17 = vpop.f32.mrb[3].mxu0  ;;  %v527_v18 = vpack.c.bf16 %v571_v15, %v648_v11  ;;  %v180_v19 = vpop.f32.mrb[3].mxu1 }
  0xe1   :  { %v266_v20 = vadd.f32 %v148_v17, %v145_v12  ;;  %v502_v21 = vpack.c.bf16 %v148_v17, %v145_v12  ;;  %v522_v22 = vpack.c.bf16 %v180_v19, %v177_v13 }
  0xe2   :  { %539 = vst [vmem:[%s682_s2 + $0x8] sm:$0xff] %v507_v16   ;;  %543 = vst [vmem:[%s682_s2 + $0x28] sm:$0xff] %v527_v18  }
  0xe3   :  { %v267_v23 = vadd.f32 %v562_v10, %v266_v20  ;;  %503 = vst [vmem:[%s682_s2] sm:$0xff] %v502_v21   ;;  %542 = vst [vmem:[%s682_s2 + $0x20] sm:$0xff] %v522_v22  }
  0xe5   :  { %v566_v24 = vpop.f32.mrb[4].mxu0  ;;  %v268_v25 = vadd.f32 %v563_v14, %v267_v23  ;;  %v574_v26 = vpop.f32.mrb[4].mxu1 }
  0xe6   :  { %v161_v27 = vpop.f32.mrb[5].mxu0  ;;  %v193_v28 = vpop.f32.mrb[5].mxu1 }
  0xe7   :  { %v269_v29 = vadd.f32 %v268_v25, %v161_v27  ;;  %v567_v30 = vpop.f32.mrb[6].mxu0  ;;  %v575_v31 = vpop.f32.mrb[6].mxu1 }
  0xe8   :  { %v517_v32 = vpack.c.bf16 %v567_v30, %v566_v24  ;;  %v164_v33 = vpop.f32.mrb[7].mxu0  ;;  %v537_v34 = vpack.c.bf16 %v575_v31, %v574_v26  ;;  %v196_v35 = vpop.f32.mrb[7].mxu1 }
  0xe9   :  { %v270_v36 = vadd.f32 %v269_v29, %v164_v33  ;;  %v512_v37 = vpack.c.bf16 %v164_v33, %v161_v27  ;;  %v532_v38 = vpack.c.bf16 %v196_v35, %v193_v28 }
  0xea   :  { %541 = vst [vmem:[%s682_s2 + $0x18] sm:$0xff] %v517_v32   ;;  %545 = vst [vmem:[%s682_s2 + $0x38] sm:$0xff] %v537_v34  }
  0xeb   :  { %v271_v39 = vadd.f32 %v566_v24, %v270_v36  ;;  %540 = vst [vmem:[%s682_s2 + $0x10] sm:$0xff] %v512_v37   ;;  %544 = vst [vmem:[%s682_s2 + $0x30] sm:$0xff] %v532_v38  }
  0xed   :  { %v272_v40 = vadd.f32 %v567_v30, %v271_v39 }
  0xef   :  { %v273_v41 = vadd.f32 %v272_v40, %v177_v13 }
  0xf1   :  { %v274_v42 = vadd.f32 %v273_v41, %v180_v19 }
  0xf3   :  { %v275_v43 = vadd.f32 %v648_v11, %v274_v42 }
  0xf5   :  { %v276_v44 = vadd.f32 %v571_v15, %v275_v43 }
  0xf7   :  { %v277_v45 = vadd.f32 %v276_v44, %v193_v28 }
  0xf9   :  { %v278_v46 = vadd.f32 %v277_v45, %v196_v35 }
  0xfb   :  { %v279_v47 = vadd.f32 %v574_v26, %v278_v46 }
  0xfd   :  { %v280_v48 = vadd.f32 %v575_v31, %v279_v47 }
  0xff   :  { %v281_v49 = vrot.slane %v280_v48, 4 }
 0x101   :  { %v282_v50 = vadd.f32 %v281_v49, %v280_v48 }
 0x103   :  { %v283_v51 = vrot.slane %v282_v50, 2 }
 0x105   :  { %v284_v52 = vadd.f32 %v283_v51, %v282_v50 }
 0x107   :  { %v285_v53 = vrot.slane %v284_v52, 1 }
 0x109   :  { %v286_v54 = vadd.f32 %v285_v53, %v284_v52 }
 0x10b   :  { %v288_v55 = vmul.f32 0.0078125, %v286_v54 }
 0x10d   :  { %v289_v56 = vsub.f32 %v145_v12, %v288_v55  ;;  %v290_v57 = vsub.f32 %v148_v17, %v288_v55  ;;  %v291_v58 = vsub.f32 %v562_v10, %v288_v55  ;;  %v292_v59 = vsub.f32 %v563_v14, %v288_v55 }
 0x10e   :  { %v293_v60 = vsub.f32 %v161_v27, %v288_v55  ;;  %v294_v61 = vsub.f32 %v164_v33, %v288_v55  ;;  %v295_v62 = vsub.f32 %v566_v24, %v288_v55  ;;  %v296_v63 = vsub.f32 %v567_v30, %v288_v55 }
 0x10f   :  { %v297_v0 = vsub.f32 %v177_v13, %v288_v55  ;;  %v298_v1 = vsub.f32 %v180_v19, %v288_v55  ;;  %v299_v2 = vsub.f32 %v648_v11, %v288_v55  ;;  %v300_v3 = vsub.f32 %v571_v15, %v288_v55 }
 0x110   :  { %v301_v4 = vsub.f32 %v193_v28, %v288_v55  ;;  %v302_v5 = vsub.f32 %v196_v35, %v288_v55  ;;  %v303_v6 = vsub.f32 %v574_v26, %v288_v55  ;;  %v304_v7 = vsub.f32 %v575_v31, %v288_v55 }
 0x111   :  { %v321_v8 = vmul.f32 %v289_v56, %v289_v56  ;;  %v322_v9 = vmul.f32 %v290_v57, %v290_v57  ;;  %v323_v16 = vmul.f32 %v291_v58, %v291_v58  ;;  %v324_v17 = vmul.f32 %v292_v59, %v292_v59 }
 0x112   :  { %v325_v14 = vmul.f32 %v293_v60, %v293_v60  ;;  %v326_v20 = vmul.f32 %v294_v61, %v294_v61  ;;  %v327_v22 = vmul.f32 %v295_v62, %v295_v62  ;;  %v328_v19 = vmul.f32 %v296_v63, %v296_v63 }
 0x113   :  { %v337_v12 = vadd.f32 %v322_v9, %v321_v8  ;;  %v329_v11 = vmul.f32 %v297_v0, %v297_v0  ;;  %v330_v24 = vmul.f32 %v298_v1, %v298_v1  ;;  %v331_v26 = vmul.f32 %v299_v2, %v299_v2 }
 0x114   :  { %v332_v28 = vmul.f32 %v300_v3, %v300_v3  ;;  %v333_v30 = vmul.f32 %v301_v4, %v301_v4  ;;  %v334_v32 = vmul.f32 %v302_v5, %v302_v5  ;;  %v335_v34 = vmul.f32 %v303_v6, %v303_v6 }
 0x115   :  { %v338_v10 = vadd.f32 %v337_v12, %v323_v16  ;;  %v336_v36 = vmul.f32 %v304_v7, %v304_v7 }
 0x117   :  { %v339_v18 = vadd.f32 %v338_v10, %v324_v17 }
 0x119   :  { %v340_v21 = vadd.f32 %v339_v18, %v325_v14 }
 0x11b   :  { %v341_v13 = vadd.f32 %v340_v21, %v326_v20 }
 0x11d   :  { %v342_v23 = vadd.f32 %v341_v13, %v327_v22 }
 0x11f   :  { %v343_v15 = vadd.f32 %v342_v23, %v328_v19 }
 0x121   :  { %v344_v25 = vadd.f32 %v343_v15, %v329_v11 }
 0x123   :  { %v345_v27 = vadd.f32 %v344_v25, %v330_v24 }
 0x125   :  { %v346_v29 = vadd.f32 %v345_v27, %v331_v26 }
 0x127   :  { %v347_v31 = vadd.f32 %v346_v29, %v332_v28 }
 0x129   :  { %v348_v33 = vadd.f32 %v347_v31, %v333_v30 }
 0x12b   :  { %v349_v35 = vadd.f32 %v348_v33, %v334_v32 }
 0x12d   :  { %v350_v37 = vadd.f32 %v349_v35, %v335_v34 }
 0x12f   :  { %v351_v38 = vadd.f32 %v350_v37, %v336_v36 }
 0x131   :  { %v352_v39 = vrot.slane %v351_v38, 4 }
 0x133   :  { %v353_v40 = vadd.f32 %v352_v39, %v351_v38 }
 0x135   :  { %v354_v41 = vrot.slane %v353_v40, 2 }
 0x137   :  { %v355_v42 = vadd.f32 %v354_v41, %v353_v40 }
 0x139   :  { %v356_v43 = vrot.slane %v355_v42, 1 }
 0x13b   :  { %v357_v44 = vadd.f32 %v356_v43, %v355_v42 }
 0x13d   :  { %v359_v45 = vsel %vm358_vm1, %v286_v54, %v357_v44 }
 0x13e   :  { %360 = vst [vmem:[%s683_s3] sm:$0x3] %v359_v45 }

// kernel: basic_block_forward.7
= control target key start
LH: loop header
LB: loop body
LE: loop exit
PB: predicated region body
PF: predicated region fallthrough
CT: control target
= control target key end

     0   :  { %s422_s0 = inlined_call_operand.vmem [shape: bf16[128,128], index: 0, kind: input, shape index: {}]   ;;  %s423_s1 = inlined_call_operand.vmem [shape: f32[1,128], index: 1, kind: input, shape index: {}]   ;;  %s424_s2 = inlined_call_operand.vmem [shape: f32[1,128], index: 2, kind: input, shape index: {}]   ;;  %s425_s3 = inlined_call_operand.vmem [shape: bf16[128,128], index: 3, kind: output, shape index: {}]  }
   0x1   :  { %v227_v0 = vld [vmem:[%s422_s0] sm:$0xff]   ;;  %v298_v4 = vld [vmem:[%s422_s0 + $0x8] sm:$0xff]   ;;  %v299_v5 = vld [vmem:[%s422_s0 + $0x10] sm:$0xff]  }
   0x2   :  { %v338_v1 = vld [vmem:[%s423_s1] ss:$0 sm:$0xff]  ;;  %v228_v2 = vunpack.c.l.bf16 %v227_v0  ;;  %v229_v3 = vunpack.c.h.bf16 %v227_v0  ;;  %v300_v6 = vld [vmem:[%s422_s0 + $0x18] sm:$0xff]   ;;  %v232_v8 = vunpack.c.l.bf16 %v298_v4  ;;  %v233_v9 = vunpack.c.h.bf16 %v298_v4  ;;  %v302_v33 = vld [vmem:[%s422_s0 + $0x28] sm:$0xff]  }
   0x3   :  { %v352_v7 = vld [vmem:[%s424_s2] ss:$0 sm:$0xff]  ;;  %v236_v10 = vunpack.c.l.bf16 %v299_v5  ;;  %v237_v11 = vunpack.c.h.bf16 %v299_v5  ;;  %v240_v14 = vunpack.c.l.bf16 %v300_v6  ;;  %v241_v15 = vunpack.c.h.bf16 %v300_v6  ;;  %v303_v38 = vld [vmem:[%s422_s0 + $0x30] sm:$0xff]   ;;  %v304_v43 = vld [vmem:[%s422_s0 + $0x38] sm:$0xff]  }
   0x4   :  { %v53_v12 = vmul.f32 %v228_v2, %v338_v1  ;;  %v54_v13 = vmul.f32 %v229_v3, %v338_v1  ;;  %v55_v16 = vmul.f32 %v232_v8, %v338_v1  ;;  %v56_v17 = vmul.f32 %v233_v9, %v338_v1  ;;  %v301_v28 = vld [vmem:[%s422_s0 + $0x20] sm:$0xff]  }
   0x5   :  { %v57_v18 = vmul.f32 %v236_v10, %v338_v1  ;;  %v58_v19 = vmul.f32 %v237_v11, %v338_v1  ;;  %v59_v22 = vmul.f32 %v240_v14, %v338_v1  ;;  %v60_v23 = vmul.f32 %v241_v15, %v338_v1 }
   0x6   :  { %v76_v20 = vadd.f32 %v352_v7, %v53_v12  ;;  %v77_v21 = vadd.f32 %v352_v7, %v54_v13  ;;  %v78_v24 = vadd.f32 %v352_v7, %v55_v16  ;;  %v79_v25 = vadd.f32 %v352_v7, %v56_v17 }
   0x7   :  { %v80_v26 = vadd.f32 %v352_v7, %v57_v18  ;;  %v81_v27 = vadd.f32 %v352_v7, %v58_v19  ;;  %v82_v31 = vadd.f32 %v352_v7, %v59_v22  ;;  %v83_v32 = vadd.f32 %v352_v7, %v60_v23 }
   0x8   :  { %v92_v29 = vmax.f32 %v76_v20, 0.0  ;;  %v93_v30 = vmax.f32 %v77_v21, 0.0  ;;  %v94_v34 = vmax.f32 %v78_v24, 0.0  ;;  %v95_v35 = vmax.f32 %v79_v25, 0.0 }
   0x9   :  { %v96_v36 = vmax.f32 %v80_v26, 0.0  ;;  %v97_v37 = vmax.f32 %v81_v27, 0.0  ;;  %v98_v40 = vmax.f32 %v82_v31, 0.0  ;;  %v99_v41 = vmax.f32 %v83_v32, 0.0 }
   0xa   :  { %v261_v39 = vpack.c.bf16 %v93_v30, %v92_v29  ;;  %v244_v42 = vunpack.c.l.bf16 %v301_v28  ;;  %v266_v44 = vpack.c.bf16 %v95_v35, %v94_v34  ;;  %v245_v46 = vunpack.c.h.bf16 %v301_v28 }
   0xb   :  { %v271_v45 = vpack.c.bf16 %v97_v37, %v96_v36  ;;  %v248_v47 = vunpack.c.l.bf16 %v302_v33  ;;  %v276_v48 = vpack.c.bf16 %v99_v41, %v98_v40  ;;  %v249_v50 = vunpack.c.h.bf16 %v302_v33 }
   0xc   :  { %262 = vst [vmem:[%s425_s3] sm:$0xff] %v261_v39   ;;  %v61_v49 = vmul.f32 %v244_v42, %v338_v1  ;;  %v252_v51 = vunpack.c.l.bf16 %v303_v38  ;;  %305 = vst [vmem:[%s425_s3 + $0x8] sm:$0xff] %v266_v44   ;;  %v62_v52 = vmul.f32 %v245_v46, %v338_v1  ;;  %v253_v54 = vunpack.c.h.bf16 %v303_v38 }
   0xd   :  { %306 = vst [vmem:[%s425_s3 + $0x10] sm:$0xff] %v271_v45   ;;  %v63_v53 = vmul.f32 %v248_v47, %v338_v1  ;;  %v256_v55 = vunpack.c.l.bf16 %v304_v43  ;;  %307 = vst [vmem:[%s425_s3 + $0x18] sm:$0xff] %v276_v48   ;;  %v64_v57 = vmul.f32 %v249_v50, %v338_v1  ;;  %v257_v59 = vunpack.c.h.bf16 %v304_v43 }
   0xe   :  { %v84_v56 = vadd.f32 %v352_v7, %v61_v49  ;;  %v65_v58 = vmul.f32 %v252_v51, %v338_v1  ;;  %v85_v60 = vadd.f32 %v352_v7, %v62_v52  ;;  %v66_v62 = vmul.f32 %v253_v54, %v338_v1 }
   0xf   :  { %v86_v61 = vadd.f32 %v352_v7, %v63_v53  ;;  %v67_v63 = vmul.f32 %v256_v55, %v338_v1  ;;  %v87_v2 = vadd.f32 %v352_v7, %v64_v57  ;;  %v68_v4 = vmul.f32 %v257_v59, %v338_v1 }
  0x10   :  { %v100_v0 = vmax.f32 %v84_v56, 0.0  ;;  %v88_v3 = vadd.f32 %v352_v7, %v65_v58  ;;  %v101_v5 = vmax.f32 %v85_v60, 0.0  ;;  %v89_v8 = vadd.f32 %v352_v7, %v66_v62 }
  0x11   :  { %v102_v6 = vmax.f32 %v86_v61, 0.0  ;;  %v90_v9 = vadd.f32 %v352_v7, %v67_v63  ;;  %v103_v10 = vmax.f32 %v87_v2, 0.0  ;;  %v91_v12 = vadd.f32 %v352_v7, %v68_v4 }
  0x12   :  { %v104_v11 = vmax.f32 %v88_v3, 0.0  ;;  %v281_v13 = vpack.c.bf16 %v101_v5, %v100_v0  ;;  %v105_v14 = vmax.f32 %v89_v8, 0.0 }
  0x13   :  { %v106_v15 = vmax.f32 %v90_v9, 0.0  ;;  %v286_v16 = vpack.c.bf16 %v103_v10, %v102_v6  ;;  %v107_v17 = vmax.f32 %v91_v12, 0.0 }
  0x14   :  { %308 = vst [vmem:[%s425_s3 + $0x20] sm:$0xff] %v281_v13   ;;  %v291_v1 = vpack.c.bf16 %v105_v14, %v104_v11 }
  0x15   :  { %309 = vst [vmem:[%s425_s3 + $0x28] sm:$0xff] %v286_v16   ;;  %v296_v18 = vpack.c.bf16 %v107_v17, %v106_v15 }
  0x16   :  { %310 = vst [vmem:[%s425_s3 + $0x30] sm:$0xff] %v291_v1  }
  0x17   :  { %311 = vst [vmem:[%s425_s3 + $0x38] sm:$0xff] %v296_v18  }

// kernel: basic_block_forward.6
= control target key start
LH: loop header
LB: loop body
LE: loop exit
PB: predicated region body
PF: predicated region fallthrough
CT: control target
= control target key end

     0   :  { %vm310_vm0 = vcmask 261120   ;;  %vm679_vm1 = vcmask 1040384   ;;  %s1292_s1 = inlined_call_operand.vmem [shape: bf16[288,128], index: 1, kind: input, shape index: {}]   ;;  %s1293_s0 = inlined_call_operand.vmem [shape: bf16[128,288], index: 0, kind: input, shape index: {}]   ;;  %s1294_s2 = inlined_call_operand.vmem [shape: bf16[128,128], index: 2, kind: output, shape index: {0}]   ;;  %s1295_s3 = inlined_call_operand.vmem [shape: f32[1,2,128], index: 3, kind: output, shape index: {1}]  }
   0x1   :  { %v1009_v0 = vld [vmem:[%s1292_s1 + $0x40] sm:$0xff]   ;;  %v1011_v2 = vld [vmem:[%s1292_s1 + $0x48] sm:$0xff]   ;;  %v1013_v4 = vld [vmem:[%s1292_s1 + $0x50] sm:$0xff]  }
   0x2   :  { %v1010_v1 = vld [vmem:[%s1292_s1] sm:$0xff]   ;;  %899 = vmatprep.subr.bf16.mxu0 %v1009_v0  ;;  %993 = vmatprep.subr.bf16.mxu1 %v1009_v0  ;;  %v1012_v3 = vld [vmem:[%s1292_s1 + $0x8] sm:$0xff]   ;;  %v1014_v5 = vld [vmem:[%s1292_s1 + $0x10] sm:$0xff]  }
   0x3   :  { %900 = vmatpush3.bf16.msra.mxu0 %v1010_v1  ;;  %1001 = vmatpush3.bf16.msra.mxu1 %v1010_v1  ;;  %v1015_v6 = vld [vmem:[%s1292_s1 + $0x58] sm:$0xff]   ;;  %v1017_v8 = vld [vmem:[%s1292_s1 + $0x60] sm:$0xff]   ;;  %v1019_v10 = vld [vmem:[%s1292_s1 + $0x68] sm:$0xff]  }
   0x4   :  { %901 = vmatprep.subr.bf16.mxu0 %v1011_v2  ;;  %994 = vmatprep.subr.bf16.mxu1 %v1011_v2  ;;  %v1016_v7 = vld [vmem:[%s1292_s1 + $0x18] sm:$0xff]   ;;  %v1018_v9 = vld [vmem:[%s1292_s1 + $0x20] sm:$0xff]   ;;  %v1020_v13 = vld [vmem:[%s1292_s1 + $0x28] sm:$0xff]  }
   0x5   :  { %v1027_v11 = vld [vmem:[%s1293_s0 + $0x4] ss:$12 sps:$4 sm:$0xff]   ;;  %v1030_v12 = vld [vmem:[%s1293_s0 + $0x94] ss:$12 sps:$4 sm:$0xff]   ;;  %v1023_v16 = vld [vmem:[%s1292_s1 + $0x78] sm:$0xff]  }
   0x6   :  { %v1021_v14 = vld [vmem:[%s1292_s1 + $0x70] sm:$0xff]   ;;  %367 = vmatprep.mubr.bf16.mxu0 %v1027_v11  ;;  %415 = vmatprep.mubr.bf16.mxu1 %v1030_v12  ;;  %v1024_v17 = vld [vmem:[%s1292_s1 + $0x38] sm:$0xff]   ;;  %v1025_v18 = vld [vmem:[%s1293_s0] ss:$12 sps:$4 sm:$0xff]  }
   0x7   :  { %902 = vmatpush3.bf16.msra.mxu0 %v1012_v3  ;;  %1002 = vmatpush3.bf16.msra.mxu1 %v1012_v3  ;;  %v1022_v15 = vld [vmem:[%s1292_s1 + $0x30] sm:$0xff]   ;;  %v1031_v19 = vld [vmem:[%s1292_s1 + $0x80] sm:$0xff]   ;;  %v1032_v21 = vld [vmem:[%s1293_s0 + $0x1c] ss:$12 sps:$4 sm:$0xff]  }
   0x8   :  { %903 = vmatprep.subr.bf16.mxu0 %v1013_v4  ;;  %995 = vmatprep.subr.bf16.mxu1 %v1013_v4  ;;  %v1028_v20 = vld [vmem:[%s1293_s0 + $0x90] ss:$12 sps:$4 sm:$0xff]   ;;  %v1034_v22 = vld [vmem:[%s1293_s0 + $0xac] ss:$12 sps:$4 sm:$0xff]   ;;  %v1037_v25 = vld [vmem:[%s1293_s0 + $0xa8] ss:$12 sps:$4 sm:$0xff]  }
   0x9   :  { %v1038_v23 = vld [vmem:[%s1292_s1 + $0x88] sm:$0xff]   ;;  %v1036_v24 = vld [vmem:[%s1293_s0 + $0x18] ss:$12 sps:$4 sm:$0xff]   ;;  %v1039_v26 = vld [vmem:[%s1293_s0 + $0x34] ss:$12 sps:$4 sm:$0xff]  }
   0xa   :  { %v1041_v27 = vld [vmem:[%s1293_s0 + $0x8] ss:$12 sps:$4 sm:$0xff]   ;;  %v1042_v28 = vld [vmem:[%s1293_s0 + $0x30] ss:$12 sps:$4 sm:$0xff]   ;;  %v1043_v29 = vld [vmem:[%s1293_s0 + $0x20] ss:$12 sps:$4 sm:$0xff]  }
   0xb   :  { %904 = vmatpush3.bf16.msra.mxu0 %v1014_v5  ;;  %1003 = vmatpush3.bf16.msra.mxu1 %v1014_v5  ;;  %v1044_v30 = vld [vmem:[%s1293_s0 + $0x4c] ss:$12 sps:$4 sm:$0xff]   ;;  %v1047_v32 = vld [vmem:[%s1293_s0 + $0x48] ss:$12 sps:$4 sm:$0xff]   ;;  %v1048_v33 = vld [vmem:[%s1293_s0 + $0x50] ss:$12 sps:$4 sm:$0xff]  }
   0xc   :  { %905 = vmatprep.subr.bf16.mxu0 %v1015_v6  ;;  %996 = vmatprep.subr.bf16.mxu1 %v1015_v6  ;;  %v1046_v31 = vld [vmem:[%s1293_s0 + $0x38] ss:$12 sps:$4 sm:$0xff]   ;;  %v1051_v35 = vld [vmem:[%s1293_s0 + $0x68] ss:$12 sps:$4 sm:$0xff]   ;;  %v1052_v36 = vld [vmem:[%s1293_s0 + $0x60] ss:$12 sps:$4 sm:$0xff]  }
   0xd   :  { %v1049_v34 = vld [vmem:[%s1293_s0 + $0x64] ss:$12 sps:$4 sm:$0xff]   ;;  %v1053_v37 = vld [vmem:[%s1293_s0 + $0x80] ss:$12 sps:$4 sm:$0xff]   ;;  %v1054_v38 = vld [vmem:[%s1293_s0 + $0x7c] ss:$12 sps:$4 sm:$0xff]  }
   0xe   :  { %v1056_v39 = vld [vmem:[%s1293_s0 + $0x98] ss:$12 sps:$4 sm:$0xff]   ;;  %v1058_v41 = vld [vmem:[%s1293_s0 + $0xb0] ss:$12 sps:$4 sm:$0xff]  }
   0xf   :  { %906 = vmatpush3.bf16.msra.mxu0 %v1016_v7  ;;  %1004 = vmatpush3.bf16.msra.mxu1 %v1016_v7  ;;  %v1057_v40 = vld [vmem:[%s1293_s0 + $0x78] ss:$12 sps:$4 sm:$0xff]  }
  0x10   :  { %907 = vmatprep.subr.bf16.mxu0 %v1017_v8  ;;  %997 = vmatprep.subr.bf16.mxu1 %v1017_v8 }
  0x13   :  { %908 = vmatpush3.bf16.msra.mxu0 %v1018_v9  ;;  %1005 = vmatpush3.bf16.msra.mxu1 %v1018_v9 }
  0x14   :  { %909 = vmatprep.subr.bf16.mxu0 %v1019_v10  ;;  %998 = vmatprep.subr.bf16.mxu1 %v1019_v10 }
  0x17   :  { %910 = vmatpush3.bf16.msra.mxu0 %v1020_v13  ;;  %1006 = vmatpush3.bf16.msra.mxu1 %v1020_v13 }
  0x18   :  { %911 = vmatprep.subr.bf16.mxu0 %v1021_v14  ;;  %999 = vmatprep.subr.bf16.mxu1 %v1021_v14 }
  0x1b   :  { %912 = vmatpush3.bf16.msra.mxu0 %v1022_v15  ;;  %1007 = vmatpush3.bf16.msra.mxu1 %v1022_v15 }
  0x1c   :  { %913 = vmatprep.subr.bf16.mxu0 %v1023_v16  ;;  %1000 = vmatprep.subr.bf16.mxu1 %v1023_v16 }
  0x1f   :  { %914 = vmatpush3.bf16.msra.mxu0 %v1024_v17  ;;  %1008 = vmatpush3.bf16.msra.mxu1 %v1024_v17 }
  0x20   :  { %973 = vmatprep.subr.bf16.mxu1 %v1031_v19 }
  0x22   :  { %368 = vmatmul.mubr.bf16.vlgmr.msra.gmra.mrb[0].mxu0 %v1025_v18  ;;  %416 = vmatmul.mubr.bf16.vlgmr.msra.gmra.mrb[0].mxu1 %v1028_v20 }
  0x23   :  { %974 = vmatpush3.bf16.msra.mxu1 %v1031_v19  ;;  %375 = vmatprep.mubr.bf16.mxu0 %v1032_v21 }
  0x24   :  { %423 = vmatprep.mubr.bf16.mxu1 %v1034_v22  ;;  %975 = vmatprep.subr.bf16.mxu1 %v1038_v23 }
  0x27   :  { %976 = vmatpush3.bf16.msra.mxu1 %v1038_v23 }
  0x2a   :  { %376 = vmatmul.mubr.bf16.gmra.mrb[4].mxu0 %v1036_v24  ;;  %424 = vmatmul.mubr.bf16.gmra.mrb[4].mxu1 %v1037_v25 }
  0x2b   :  { %383 = vmatprep.mubr.bf16.mxu0 %v1039_v26  ;;  %977 = vmatprep.mubr.msk.bf16.mxu1 %vm310_vm0, %v1041_v27 }
  0x32   :  { %384 = vmatmul.mubr.bf16.gmra.mrb[8].mxu0 %v1042_v28  ;;  %978 = vmatmul.mubr.msk.bf16.vlgmr.msra.gmra.mrb[8].mxu1 %vm310_vm0, %v1043_v29 }
  0x33   :  { %391 = vmatprep.mubr.bf16.mxu0 %v1044_v30  ;;  %981 = vmatprep.mubr.msk.bf16.mxu1 %vm310_vm0, %v1046_v31 }
  0x3a   :  { %392 = vmatmul.mubr.bf16.gmra.mrb[12].mxu0 %v1047_v32  ;;  %982 = vmatmul.mubr.msk.bf16.gmra.mrb[12].mxu1 %vm310_vm0, %v1048_v33 }
  0x3b   :  { %399 = vmatprep.mubr.bf16.mxu0 %v1049_v34  ;;  %985 = vmatprep.mubr.msk.bf16.mxu1 %vm310_vm0, %v1051_v35 }
  0x42   :  { %400 = vmatmul.mubr.bf16.gmra.mrb[16].mxu0 %v1052_v36  ;;  %986 = vmatmul.mubr.msk.bf16.gmra.mrb[16].mxu1 %vm310_vm0, %v1053_v37 }
  0x43   :  { %407 = vmatprep.mubr.bf16.mxu0 %v1054_v38  ;;  %989 = vmatprep.mubr.msk.bf16.mxu1 %vm310_vm0, %v1056_v39 }
  0x4a   :  { %408 = vmatmul.mubr.bf16.gmra.mrb[20].mxu0 %v1057_v40  ;;  %990 = vmatmul.mubr.msk.bf16.gmra.mrb[20].mxu1 %vm310_vm0, %v1058_v41 }
  0xf5   :  { %v915_v42 = vpop.f32.mrb[0].mxu0  ;;  %v951_v43 = vpop.f32.mrb[0].mxu1 }
  0xf6   :  { %v916_v44 = vpop.f32.mrb[1].mxu0  ;;  %v952_v45 = vpop.f32.mrb[1].mxu1 }
  0xf7   :  { %v917_v46 = vadd.f32 %v916_v44, %v915_v42  ;;  %v918_v47 = vpop.f32.mrb[2].mxu0  ;;  %v1213_v48 = vadd.f32 %v952_v45, %v951_v43  ;;  %v954_v49 = vpop.f32.mrb[2].mxu1 }
  0xf8   :  { %v919_v50 = vpop.f32.mrb[3].mxu0  ;;  %v955_v51 = vpop.f32.mrb[3].mxu1 }
  0xf9   :  { %v920_v52 = vadd.f32 %v919_v50, %v918_v47  ;;  %v1215_v53 = vadd.f32 %v955_v51, %v954_v49 }
  0xfd   :  { %v921_v54 = vpop.f32.mrb[4].mxu0  ;;  %v957_v55 = vpop.f32.mrb[4].mxu1 }
  0xfe   :  { %v922_v56 = vpop.f32.mrb[5].mxu0  ;;  %v958_v57 = vpop.f32.mrb[5].mxu1 }
  0xff   :  { %v923_v58 = vadd.f32 %v922_v56, %v921_v54  ;;  %v924_v59 = vpop.f32.mrb[6].mxu0  ;;  %v1217_v60 = vadd.f32 %v958_v57, %v957_v55  ;;  %v960_v61 = vpop.f32.mrb[6].mxu1 }
 0x100   :  { %v925_v62 = vpop.f32.mrb[7].mxu0  ;;  %v961_v63 = vpop.f32.mrb[7].mxu1 }
 0x101   :  { %v926_v0 = vadd.f32 %v925_v62, %v924_v59  ;;  %v1219_v1 = vadd.f32 %v961_v63, %v960_v61 }
 0x105   :  { %v927_v2 = vpop.f32.mrb[8].mxu0  ;;  %v979_v3 = vpop.f32.mrb[8].mxu1 }
 0x106   :  { %v1221_v4 = vadd.f32 %v979_v3, %v923_v58  ;;  %v928_v5 = vpop.f32.mrb[9].mxu0  ;;  %v466_v6 = vpop.f32.mrb[9].mxu1 }
 0x107   :  { %v929_v7 = vadd.f32 %v928_v5, %v927_v2  ;;  %v1223_v8 = vadd.f32 %v917_v46, %v466_v6  ;;  %v930_v9 = vpop.f32.mrb[10].mxu0  ;;  %v980_v10 = vpop.f32.mrb[10].mxu1 }
 0x108   :  { %v1225_v11 = vadd.f32 %v980_v10, %v926_v0  ;;  %v931_v12 = vpop.f32.mrb[11].mxu0  ;;  %v469_v13 = vpop.f32.mrb[11].mxu1 }
 0x109   :  { %v932_v14 = vadd.f32 %v931_v12, %v930_v9  ;;  %v1227_v15 = vadd.f32 %v920_v52, %v469_v13 }
 0x10a   :  { %v860_v16 = vpack.c.bf16 %v1225_v11, %v1221_v4 }
 0x10b   :  { %v587_v17 = vadd.f32 %v1227_v15, %v1223_v8  ;;  %v855_v18 = vpack.c.bf16 %v1227_v15, %v1223_v8 }
 0x10c   :  { %892 = vst [vmem:[%s1294_s2 + $0x8] sm:$0xff] %v860_v16  }
 0x10d   :  { %v588_v19 = vadd.f32 %v587_v17, %v1221_v4  ;;  %856 = vst [vmem:[%s1294_s2] sm:$0xff] %v855_v18   ;;  %v933_v20 = vpop.f32.mrb[12].mxu0  ;;  %v983_v21 = vpop.f32.mrb[12].mxu1 }
 0x10e   :  { %v934_v22 = vpop.f32.mrb[13].mxu0  ;;  %v482_v23 = vpop.f32.mrb[13].mxu1 }
 0x10f   :  { %v935_v24 = vadd.f32 %v934_v22, %v933_v20  ;;  %v1242_v25 = vadd.f32 %v929_v7, %v482_v23  ;;  %v589_v26 = vadd.f32 %v588_v19, %v1225_v11  ;;  %v936_v27 = vpop.f32.mrb[14].mxu0  ;;  %v984_v28 = vpop.f32.mrb[14].mxu1 }
 0x110   :  { %v937_v29 = vpop.f32.mrb[15].mxu0  ;;  %v485_v30 = vpop.f32.mrb[15].mxu1 }
 0x111   :  { %v1245_v31 = vadd.f32 %v983_v21, %v935_v24  ;;  %v590_v32 = vadd.f32 %v589_v26, %v1242_v25  ;;  %v938_v33 = vadd.f32 %v937_v29, %v936_v27  ;;  %v1248_v34 = vadd.f32 %v932_v14, %v485_v30 }
 0x113   :  { %v1250_v35 = vadd.f32 %v984_v28, %v938_v33  ;;  %v591_v36 = vadd.f32 %v590_v32, %v1248_v34  ;;  %v865_v37 = vpack.c.bf16 %v1248_v34, %v1242_v25 }
 0x115   :  { %v870_v38 = vpack.c.bf16 %v1250_v35, %v1245_v31  ;;  %v592_v39 = vadd.f32 %v591_v36, %v1245_v31  ;;  %893 = vst [vmem:[%s1294_s2 + $0x10] sm:$0xff] %v865_v37   ;;  %v939_v40 = vpop.f32.mrb[16].mxu0  ;;  %v987_v41 = vpop.f32.mrb[16].mxu1 }
 0x116   :  { %v940_v42 = vpop.f32.mrb[17].mxu0  ;;  %v498_v43 = vpop.f32.mrb[17].mxu1 }
 0x117   :  { %894 = vst [vmem:[%s1294_s2 + $0x18] sm:$0xff] %v870_v38   ;;  %v941_v44 = vadd.f32 %v940_v42, %v939_v40  ;;  %v942_v45 = vpop.f32.mrb[18].mxu0  ;;  %v593_v46 = vadd.f32 %v592_v39, %v1250_v35  ;;  %v988_v47 = vpop.f32.mrb[18].mxu1 }
 0x118   :  { %v943_v49 = vpop.f32.mrb[19].mxu0  ;;  %v501_v50 = vpop.f32.mrb[19].mxu1 }
 0x119   :  { %v944_v51 = vadd.f32 %v943_v49, %v942_v45  ;;  %v499_v52 = vadd.f32 %v941_v44, %v498_v43 }
 0x11b   :  { %v594_v54 = vadd.f32 %v593_v46, %v499_v52  ;;  %v502_v55 = vadd.f32 %v944_v51, %v501_v50 }
 0x11d   :  { %v595_v56 = vadd.f32 %v594_v54, %v502_v55  ;;  %v875_v57 = vpack.c.bf16 %v502_v55, %v499_v52  ;;  %v945_v58 = vpop.f32.mrb[20].mxu0  ;;  %v991_v59 = vpop.f32.mrb[20].mxu1 }
 0x11e   :  { %v523_v61 = vadd.f32 %v991_v59, %v1217_v60  ;;  %v946_v62 = vpop.f32.mrb[21].mxu0  ;;  %v514_v63 = vpop.f32.mrb[21].mxu1 }
 0x11f   :  { %895 = vst [vmem:[%s1294_s2 + $0x20] sm:$0xff] %v875_v57   ;;  %v947_v0 = vadd.f32 %v946_v62, %v945_v58  ;;  %v515_v2 = vadd.f32 %v1213_v48, %v514_v63  ;;  %v948_v3 = vpop.f32.mrb[22].mxu0  ;;  %v992_v5 = vpop.f32.mrb[22].mxu1 }
 0x120   :  { %v526_v6 = vadd.f32 %v992_v5, %v1219_v1  ;;  %v949_v7 = vpop.f32.mrb[23].mxu0  ;;  %v517_v9 = vpop.f32.mrb[23].mxu1 }
 0x121   :  { %v507_v10 = vadd.f32 %v987_v41, %v947_v0  ;;  %v950_v12 = vadd.f32 %v949_v7, %v948_v3  ;;  %v518_v13 = vadd.f32 %v1215_v53, %v517_v9 }
 0x122   :  { %v890_v60 = vpack.c.bf16 %v526_v6, %v523_v61 }
 0x123   :  { %v596_v14 = vadd.f32 %v595_v56, %v507_v10  ;;  %v510_v16 = vadd.f32 %v988_v47, %v950_v12  ;;  %v885_v17 = vpack.c.bf16 %v518_v13, %v515_v2 }
 0x124   :  { %898 = vst [vmem:[%s1294_s2 + $0x38] sm:$0xff] %v890_v60  }
 0x125   :  { %v597_v18 = vadd.f32 %v596_v14, %v510_v16  ;;  %v880_v48 = vpack.c.bf16 %v510_v16, %v507_v10  ;;  %897 = vst [vmem:[%s1294_s2 + $0x30] sm:$0xff] %v885_v17  }
 0x127   :  { %896 = vst [vmem:[%s1294_s2 + $0x28] sm:$0xff] %v880_v48   ;;  %v598_v1 = vadd.f32 %v597_v18, %v515_v2 }
 0x129   :  { %v599_v53 = vadd.f32 %v598_v1, %v518_v13 }
 0x12b   :  { %v600_v19 = vadd.f32 %v599_v53, %v523_v61 }
 0x12d   :  { %v601_v20 = vadd.f32 %v600_v19, %v526_v6 }
 0x12f   :  { %v602_v21 = vrot.slane %v601_v20, 4 }
 0x131   :  { %v603_v22 = vadd.f32 %v602_v21, %v601_v20 }
 0x133   :  { %v604_v23 = vrot.slane %v603_v22, 2 }
 0x135   :  { %v605_v24 = vadd.f32 %v604_v23, %v603_v22 }
 0x137   :  { %v606_v26 = vrot.slane %v605_v24, 1 }
 0x139   :  { %v607_v27 = vadd.f32 %v606_v26, %v605_v24 }
 0x13b   :  { %v609_v28 = vmul.f32 0.0078125, %v607_v27 }
 0x13d   :  { %v610_v29 = vsub.f32 %v1223_v8, %v609_v28  ;;  %v611_v30 = vsub.f32 %v1227_v15, %v609_v28  ;;  %v612_v32 = vsub.f32 %v1221_v4, %v609_v28  ;;  %v613_v33 = vsub.f32 %v1225_v11, %v609_v28 }
 0x13e   :  { %v614_v36 = vsub.f32 %v1242_v25, %v609_v28  ;;  %v615_v37 = vsub.f32 %v1248_v34, %v609_v28  ;;  %v616_v38 = vsub.f32 %v1245_v31, %v609_v28  ;;  %v617_v39 = vsub.f32 %v1250_v35, %v609_v28 }
 0x13f   :  { %v618_v40 = vsub.f32 %v499_v52, %v609_v28  ;;  %v619_v41 = vsub.f32 %v502_v55, %v609_v28  ;;  %v620_v42 = vsub.f32 %v507_v10, %v609_v28  ;;  %v621_v43 = vsub.f32 %v510_v16, %v609_v28 }
 0x140   :  { %v622_v44 = vsub.f32 %v515_v2, %v609_v28  ;;  %v623_v8 = vsub.f32 %v518_v13, %v609_v28  ;;  %v624_v45 = vsub.f32 %v523_v61, %v609_v28  ;;  %v625_v15 = vsub.f32 %v526_v6, %v609_v28 }
 0x141   :  { %v642_v46 = vmul.f32 %v610_v29, %v610_v29  ;;  %v643_v4 = vmul.f32 %v611_v30, %v611_v30  ;;  %v644_v47 = vmul.f32 %v612_v32, %v612_v32  ;;  %v645_v49 = vmul.f32 %v613_v33, %v613_v33 }
 0x142   :  { %v646_v50 = vmul.f32 %v614_v36, %v614_v36  ;;  %v647_v51 = vmul.f32 %v615_v37, %v615_v37  ;;  %v648_v54 = vmul.f32 %v616_v38, %v616_v38  ;;  %v649_v52 = vmul.f32 %v617_v39, %v617_v39 }
 0x143   :  { %v658_v11 = vadd.f32 %v643_v4, %v642_v46  ;;  %v650_v56 = vmul.f32 %v618_v40, %v618_v40  ;;  %v651_v58 = vmul.f32 %v619_v41, %v619_v41  ;;  %v652_v61 = vmul.f32 %v620_v42, %v620_v42 }
 0x144   :  { %v653_v63 = vmul.f32 %v621_v43, %v621_v43  ;;  %v654_v2 = vmul.f32 %v622_v44, %v622_v44  ;;  %v655_v5 = vmul.f32 %v623_v8, %v623_v8  ;;  %v656_v7 = vmul.f32 %v624_v45, %v624_v45 }
 0x145   :  { %v659_v25 = vadd.f32 %v658_v11, %v644_v47  ;;  %v657_v10 = vmul.f32 %v625_v15, %v625_v15 }
 0x147   :  { %v660_v34 = vadd.f32 %v659_v25, %v645_v49 }
 0x149   :  { %v661_v31 = vadd.f32 %v660_v34, %v646_v50 }
 0x14b   :  { %v662_v35 = vadd.f32 %v661_v31, %v647_v51 }
 0x14d   :  { %v663_v55 = vadd.f32 %v662_v35, %v648_v54 }
 0x14f   :  { %v664_v57 = vadd.f32 %v663_v55, %v649_v52 }
 0x151   :  { %v665_v59 = vadd.f32 %v664_v57, %v650_v56 }
 0x153   :  { %v666_v62 = vadd.f32 %v665_v59, %v651_v58 }
 0x155   :  { %v667_v0 = vadd.f32 %v666_v62, %v652_v61 }
 0x157   :  { %v668_v3 = vadd.f32 %v667_v0, %v653_v63 }
 0x159   :  { %v669_v6 = vadd.f32 %v668_v3, %v654_v2 }
 0x15b   :  { %v670_v9 = vadd.f32 %v669_v6, %v655_v5 }
 0x15d   :  { %v671_v12 = vadd.f32 %v670_v9, %v656_v7 }
 0x15f   :  { %v672_v13 = vadd.f32 %v671_v12, %v657_v10 }
 0x161   :  { %v673_v60 = vrot.slane %v672_v13, 4 }
 0x163   :  { %v674_v14 = vadd.f32 %v673_v60, %v672_v13 }
 0x165   :  { %v675_v16 = vrot.slane %v674_v14, 2 }
 0x167   :  { %v676_v17 = vadd.f32 %v675_v16, %v674_v14 }
 0x169   :  { %v677_v18 = vrot.slane %v676_v17, 1 }
 0x16b   :  { %v678_v48 = vadd.f32 %v677_v18, %v676_v17 }
 0x16d   :  { %v680_v1 = vsel %vm679_vm1, %v607_v27, %v678_v48 }
 0x16e   :  { %681 = vst [vmem:[%s1295_s3] sm:$0x3] %v680_v1 }

// kernel: basic_block_forward.11
= control target key start
LH: loop header
LB: loop body
LE: loop exit
PB: predicated region body
PF: predicated region fallthrough
CT: control target
= control target key end

     0   :  { %s541_s0 = inlined_call_operand.vmem [shape: bf16[128,128], index: 0, kind: input, shape index: {}]   ;;  %s542_s1 = inlined_call_operand.vmem [shape: f32[1,128], index: 1, kind: input, shape index: {}]   ;;  %s543_s2 = inlined_call_operand.vmem [shape: f32[1,128], index: 2, kind: input, shape index: {}]   ;;  %s544_s3 = inlined_call_operand.vmem [shape: bf16[128,128], index: 3, kind: input, shape index: {}]   ;;  %s545_s4 = inlined_call_operand.vmem [shape: bf16[128,128], index: 4, kind: output, shape index: {}]  }
   0x1   :  { %v278_v0 = vld [vmem:[%s541_s0] sm:$0xff]   ;;  %v381_v5 = vld [vmem:[%s541_s0 + $0x8] sm:$0xff]   ;;  %v382_v12 = vld [vmem:[%s541_s0 + $0x10] sm:$0xff]  }
   0x2   :  { %v433_v1 = vld [vmem:[%s542_s1] ss:$0 sm:$0xff]  ;;  %v279_v2 = vunpack.c.l.bf16 %v278_v0  ;;  %v280_v3 = vunpack.c.h.bf16 %v278_v0  ;;  %v388_v6 = vld [vmem:[%s544_s3 + $0x8] sm:$0xff]   ;;  %v283_v10 = vunpack.c.l.bf16 %v381_v5  ;;  %v284_v11 = vunpack.c.h.bf16 %v381_v5  ;;  %v389_v13 = vld [vmem:[%s544_s3 + $0x10] sm:$0xff]  }
   0x3   :  { %v310_v4 = vld [vmem:[%s544_s3] sm:$0xff]   ;;  %v315_v16 = vunpack.c.l.bf16 %v388_v6  ;;  %v316_v17 = vunpack.c.h.bf16 %v388_v6  ;;  %v287_v20 = vunpack.c.l.bf16 %v382_v12  ;;  %v288_v21 = vunpack.c.h.bf16 %v382_v12  ;;  %v383_v22 = vld [vmem:[%s541_s0 + $0x18] sm:$0xff]   ;;  %v385_v54 = vld [vmem:[%s541_s0 + $0x28] sm:$0xff]  }
   0x4   :  { %v447_v7 = vld [vmem:[%s543_s2] ss:$0 sm:$0xff]  ;;  %v311_v8 = vunpack.c.l.bf16 %v310_v4  ;;  %v312_v9 = vunpack.c.h.bf16 %v310_v4  ;;  %v56_v14 = vmul.f32 %v279_v2, %v433_v1  ;;  %v57_v15 = vmul.f32 %v280_v3, %v433_v1  ;;  %v390_v39 = vld [vmem:[%s544_s3 + $0x18] sm:$0xff]   ;;  %v392_v63 = vld [vmem:[%s544_s3 + $0x28] sm:$0xff]  }
   0x5   :  { %v58_v18 = vmul.f32 %v283_v10, %v433_v1  ;;  %v59_v19 = vmul.f32 %v284_v11, %v433_v1  ;;  %v319_v25 = vunpack.c.l.bf16 %v389_v13  ;;  %v320_v26 = vunpack.c.h.bf16 %v389_v13  ;;  %v384_v48 = vld [vmem:[%s541_s0 + $0x20] sm:$0xff]   ;;  %v386_v5 = vld [vmem:[%s541_s0 + $0x30] sm:$0xff]  }
   0x6   :  { %v79_v23 = vadd.f32 %v447_v7, %v56_v14  ;;  %v80_v24 = vadd.f32 %v447_v7, %v57_v15  ;;  %v60_v29 = vmul.f32 %v287_v20, %v433_v1  ;;  %v61_v30 = vmul.f32 %v288_v21, %v433_v1  ;;  %v391_v49 = vld [vmem:[%s544_s3 + $0x20] sm:$0xff]   ;;  %v393_v11 = vld [vmem:[%s544_s3 + $0x30] sm:$0xff]   ;;  %v387_v20 = vld [vmem:[%s541_s0 + $0x38] sm:$0xff]  }
   0x7   :  { %v81_v27 = vadd.f32 %v447_v7, %v58_v18  ;;  %v82_v28 = vadd.f32 %v447_v7, %v59_v19  ;;  %v291_v33 = vunpack.c.l.bf16 %v383_v22  ;;  %v292_v34 = vunpack.c.h.bf16 %v383_v22 }
   0x8   :  { %v127_v31 = vadd.f32 %v311_v8, %v79_v23  ;;  %v128_v32 = vadd.f32 %v312_v9, %v80_v24  ;;  %v83_v37 = vadd.f32 %v447_v7, %v60_v29  ;;  %v84_v38 = vadd.f32 %v447_v7, %v61_v30 }
   0x9   :  { %v129_v35 = vadd.f32 %v315_v16, %v81_v27  ;;  %v130_v36 = vadd.f32 %v316_v17, %v82_v28  ;;  %v62_v42 = vmul.f32 %v291_v33, %v433_v1  ;;  %v63_v43 = vmul.f32 %v292_v34, %v433_v1  ;;  %v394_v33 = vld [vmem:[%s544_s3 + $0x38] sm:$0xff]  }
   0xa   :  { %v143_v40 = vmax.f32 %v127_v31, 0.0  ;;  %v144_v41 = vmax.f32 %v128_v32, 0.0  ;;  %v131_v46 = vadd.f32 %v319_v25, %v83_v37  ;;  %v132_v47 = vadd.f32 %v320_v26, %v84_v38 }
   0xb   :  { %v145_v44 = vmax.f32 %v129_v35, 0.0  ;;  %v146_v45 = vmax.f32 %v130_v36, 0.0  ;;  %v85_v51 = vadd.f32 %v447_v7, %v62_v42  ;;  %v86_v52 = vadd.f32 %v447_v7, %v63_v43 }
   0xc   :  { %v344_v50 = vpack.c.bf16 %v144_v41, %v143_v40  ;;  %v323_v53 = vunpack.c.l.bf16 %v390_v39  ;;  %v147_v56 = vmax.f32 %v131_v46, 0.0  ;;  %v148_v57 = vmax.f32 %v132_v47, 0.0 }
   0xd   :  { %v349_v55 = vpack.c.bf16 %v146_v45, %v145_v44  ;;  %v324_v58 = vunpack.c.h.bf16 %v390_v39  ;;  %v295_v60 = vunpack.c.l.bf16 %v384_v48  ;;  %v296_v61 = vunpack.c.h.bf16 %v384_v48 }
   0xe   :  { %345 = vst [vmem:[%s545_s4] sm:$0xff] %v344_v50   ;;  %v133_v59 = vadd.f32 %v323_v53, %v85_v51  ;;  %v327_v62 = vunpack.c.l.bf16 %v391_v49  ;;  %v354_v0 = vpack.c.bf16 %v148_v57, %v147_v56  ;;  %v328_v3 = vunpack.c.h.bf16 %v391_v49 }
   0xf   :  { %395 = vst [vmem:[%s545_s4 + $0x8] sm:$0xff] %v349_v55   ;;  %v134_v2 = vadd.f32 %v324_v58, %v86_v52  ;;  %v299_v4 = vunpack.c.l.bf16 %v385_v54  ;;  %v64_v8 = vmul.f32 %v295_v60, %v433_v1  ;;  %v65_v9 = vmul.f32 %v296_v61, %v433_v1 }
  0x10   :  { %v149_v6 = vmax.f32 %v133_v59, 0.0  ;;  %v300_v10 = vunpack.c.h.bf16 %v385_v54  ;;  %396 = vst [vmem:[%s545_s4 + $0x10] sm:$0xff] %v354_v0   ;;  %v331_v14 = vunpack.c.l.bf16 %v392_v63  ;;  %v332_v15 = vunpack.c.h.bf16 %v392_v63 }
  0x11   :  { %v150_v12 = vmax.f32 %v134_v2, 0.0  ;;  %v66_v13 = vmul.f32 %v299_v4, %v433_v1  ;;  %v87_v16 = vadd.f32 %v447_v7, %v64_v8  ;;  %v88_v17 = vadd.f32 %v447_v7, %v65_v9 }
  0x12   :  { %v67_v18 = vmul.f32 %v300_v10, %v433_v1  ;;  %v303_v19 = vunpack.c.l.bf16 %v386_v5  ;;  %v304_v23 = vunpack.c.h.bf16 %v386_v5  ;;  %v335_v24 = vunpack.c.l.bf16 %v393_v11 }
  0x13   :  { %v359_v21 = vpack.c.bf16 %v150_v12, %v149_v6  ;;  %v89_v22 = vadd.f32 %v447_v7, %v66_v13  ;;  %v135_v25 = vadd.f32 %v327_v62, %v87_v16  ;;  %v136_v26 = vadd.f32 %v328_v3, %v88_v17 }
  0x14   :  { %v90_v27 = vadd.f32 %v447_v7, %v67_v18  ;;  %v68_v28 = vmul.f32 %v303_v19, %v433_v1  ;;  %v69_v30 = vmul.f32 %v304_v23, %v433_v1  ;;  %v336_v31 = vunpack.c.h.bf16 %v393_v11 }
  0x15   :  { %397 = vst [vmem:[%s545_s4 + $0x18] sm:$0xff] %v359_v21   ;;  %v137_v29 = vadd.f32 %v331_v14, %v89_v22  ;;  %v307_v32 = vunpack.c.l.bf16 %v387_v20  ;;  %v151_v34 = vmax.f32 %v135_v25, 0.0  ;;  %v152_v35 = vmax.f32 %v136_v26, 0.0 }
  0x16   :  { %v138_v36 = vadd.f32 %v332_v15, %v90_v27  ;;  %v91_v37 = vadd.f32 %v447_v7, %v68_v28  ;;  %v92_v39 = vadd.f32 %v447_v7, %v69_v30  ;;  %v308_v40 = vunpack.c.h.bf16 %v387_v20 }
  0x17   :  { %v153_v38 = vmax.f32 %v137_v29, 0.0  ;;  %v70_v41 = vmul.f32 %v307_v32, %v433_v1  ;;  %v364_v42 = vpack.c.bf16 %v152_v35, %v151_v34  ;;  %v339_v45 = vunpack.c.l.bf16 %v394_v33 }
  0x18   :  { %v154_v43 = vmax.f32 %v138_v36, 0.0  ;;  %v139_v44 = vadd.f32 %v335_v24, %v91_v37  ;;  %v140_v46 = vadd.f32 %v336_v31, %v92_v39  ;;  %v71_v47 = vmul.f32 %v308_v40, %v433_v1 }
  0x19   :  { %v93_v48 = vadd.f32 %v447_v7, %v70_v41  ;;  %v340_v49 = vunpack.c.h.bf16 %v394_v33  ;;  %398 = vst [vmem:[%s545_s4 + $0x20] sm:$0xff] %v364_v42  }
  0x1a   :  { %v369_v50 = vpack.c.bf16 %v154_v43, %v153_v38  ;;  %v155_v51 = vmax.f32 %v139_v44, 0.0  ;;  %v156_v52 = vmax.f32 %v140_v46, 0.0  ;;  %v94_v53 = vadd.f32 %v447_v7, %v71_v47 }
  0x1b   :  { %v141_v54 = vadd.f32 %v339_v45, %v93_v48 }
  0x1c   :  { %399 = vst [vmem:[%s545_s4 + $0x28] sm:$0xff] %v369_v50   ;;  %v374_v55 = vpack.c.bf16 %v156_v52, %v155_v51  ;;  %v142_v56 = vadd.f32 %v340_v49, %v94_v53 }
  0x1d   :  { %v157_v1 = vmax.f32 %v141_v54, 0.0 }
  0x1e   :  { %400 = vst [vmem:[%s545_s4 + $0x30] sm:$0xff] %v374_v55   ;;  %v158_v57 = vmax.f32 %v142_v56, 0.0 }
  0x20   :  { %v379_v58 = vpack.c.bf16 %v158_v57, %v157_v1 }
  0x22   :  { %401 = vst [vmem:[%s545_s4 + $0x38] sm:$0xff] %v379_v58  }

// kernel: basic_block_forward.10
= control target key start
LH: loop header
LB: loop body
LE: loop exit
PB: predicated region body
PF: predicated region fallthrough
CT: control target
= control target key end

     0   :  { %vm550_vm0 = vcmask 523264   ;;  %vm1016_vm1 = vcmask 1040384   ;;  %s1876_s1 = inlined_call_operand.vmem [shape: bf16[576,128], index: 1, kind: input, shape index: {}]   ;;  %s1877_s0 = inlined_call_operand.vmem [shape: bf16[128,576], index: 0, kind: input, shape index: {}]   ;;  %s1878_s2 = inlined_call_operand.vmem [shape: bf16[128,128], index: 2, kind: output, shape index: {0}]   ;;  %s1879_s3 = inlined_call_operand.vmem [shape: f32[1,2,128], index: 3, kind: output, shape index: {1}]  }
   0x1   :  { %v1442_v0 = vld [vmem:[%s1876_s1 + $0x40] sm:$0xff]   ;;  %v1446_v4 = vld [vmem:[%s1876_s1 + $0x48] sm:$0xff]   ;;  %v1450_v8 = vld [vmem:[%s1876_s1 + $0x50] sm:$0xff]  }
   0x2   :  { %v1443_v1 = vld [vmem:[%s1876_s1 + $0xc0] sm:$0xff]   ;;  %1270 = vmatprep.subr.bf16.mxu0 %v1442_v0  ;;  %v1447_v5 = vld [vmem:[%s1876_s1 + $0xc8] sm:$0xff]   ;;  %v1451_v9 = vld [vmem:[%s1876_s1 + $0xd0] sm:$0xff]  }
   0x3   :  { %v1444_v2 = vld [vmem:[%s1876_s1] sm:$0xff]   ;;  %1334 = vmatprep.subr.bf16.mxu1 %v1443_v1  ;;  %v1448_v6 = vld [vmem:[%s1876_s1 + $0x8] sm:$0xff]   ;;  %v1452_v10 = vld [vmem:[%s1876_s1 + $0x10] sm:$0xff]  }
   0x4   :  { %v1445_v3 = vld [vmem:[%s1876_s1 + $0x80] sm:$0xff]   ;;  %1271 = vmatpush3.bf16.msra.mxu0 %v1444_v2  ;;  %v1449_v7 = vld [vmem:[%s1876_s1 + $0x88] sm:$0xff]   ;;  %v1453_v11 = vld [vmem:[%s1876_s1 + $0x90] sm:$0xff]  }
   0x5   :  { %1335 = vmatpush3.bf16.msra.mxu1 %v1445_v3  ;;  %1272 = vmatprep.subr.bf16.mxu0 %v1446_v4  ;;  %v1454_v12 = vld [vmem:[%s1876_s1 + $0x58] sm:$0xff]   ;;  %v1458_v16 = vld [vmem:[%s1876_s1 + $0x60] sm:$0xff]   ;;  %v1462_v20 = vld [vmem:[%s1876_s1 + $0x68] sm:$0xff]  }
   0x6   :  { %1336 = vmatprep.subr.bf16.mxu1 %v1447_v5  ;;  %v1455_v13 = vld [vmem:[%s1876_s1 + $0xd8] sm:$0xff]   ;;  %v1459_v17 = vld [vmem:[%s1876_s1 + $0xe0] sm:$0xff]   ;;  %v1463_v21 = vld [vmem:[%s1876_s1 + $0xe8] sm:$0xff]  }
   0x7   :  { %v1456_v14 = vld [vmem:[%s1876_s1 + $0x18] sm:$0xff]   ;;  %v1460_v18 = vld [vmem:[%s1876_s1 + $0x20] sm:$0xff]   ;;  %v1464_v22 = vld [vmem:[%s1876_s1 + $0x28] sm:$0xff]  }
   0x8   :  { %1273 = vmatpush3.bf16.msra.mxu0 %v1448_v6  ;;  %v1457_v15 = vld [vmem:[%s1876_s1 + $0x98] sm:$0xff]   ;;  %v1461_v19 = vld [vmem:[%s1876_s1 + $0xa0] sm:$0xff]   ;;  %v1465_v23 = vld [vmem:[%s1876_s1 + $0xa8] sm:$0xff]  }
   0x9   :  { %1337 = vmatpush3.bf16.msra.mxu1 %v1449_v7  ;;  %1274 = vmatprep.subr.bf16.mxu0 %v1450_v8  ;;  %v1466_v24 = vld [vmem:[%s1876_s1 + $0x70] sm:$0xff]   ;;  %v1470_v28 = vld [vmem:[%s1876_s1 + $0x78] sm:$0xff]   ;;  %v1479_v35 = vld [vmem:[%s1877_s0 + $0xc] ss:$20 sps:$4 sm:$0xff]  }
   0xa   :  { %1338 = vmatprep.subr.bf16.mxu1 %v1451_v9  ;;  %v1467_v25 = vld [vmem:[%s1876_s1 + $0xf0] sm:$0xff]   ;;  %v1471_v29 = vld [vmem:[%s1876_s1 + $0xf8] sm:$0xff]   ;;  %v1480_v36 = vld [vmem:[%s1876_s1 + $0x100] sm:$0xff]   ;;  %704 = vmatprep.mubr.bf16.mxu1 %v1479_v35 }
   0xb   :  { %v1468_v26 = vld [vmem:[%s1876_s1 + $0x30] sm:$0xff]   ;;  %v1472_v30 = vld [vmem:[%s1876_s1 + $0x38] sm:$0xff]   ;;  %v1481_v37 = vld [vmem:[%s1877_s0 + $0x2c] ss:$20 sps:$4 sm:$0xff]  }
   0xc   :  { %1275 = vmatpush3.bf16.msra.mxu0 %v1452_v10  ;;  %v1469_v27 = vld [vmem:[%s1876_s1 + $0xb0] sm:$0xff]   ;;  %v1473_v31 = vld [vmem:[%s1876_s1 + $0xb8] sm:$0xff]   ;;  %v1493_v42 = vld [vmem:[%s1876_s1 + $0x108] sm:$0xff]  }
   0xd   :  { %1339 = vmatpush3.bf16.msra.mxu1 %v1453_v11  ;;  %1276 = vmatprep.subr.bf16.mxu0 %v1454_v12  ;;  %v1474_v32 = vld [vmem:[%s1877_s0] ss:$20 sps:$4 sm:$0xff]   ;;  %v1476_v33 = vld [vmem:[%s1877_s0 + $0x4] ss:$20 sps:$4 sm:$0xff]   ;;  %v1477_v34 = vld [vmem:[%s1877_s0 + $0x8] ss:$20 sps:$4 sm:$0xff]  }
   0xe   :  { %1340 = vmatprep.subr.bf16.mxu1 %v1455_v13  ;;  %607 = vmatprep.mubr.bf16.mxu0 %v1476_v33  ;;  %v1483_v38 = vld [vmem:[%s1877_s0 + $0x34] ss:$20 sps:$4 sm:$0xff]   ;;  %v1486_v40 = vld [vmem:[%s1877_s0 + $0x30] ss:$20 sps:$4 sm:$0xff]   ;;  %v1492_v45 = vld [vmem:[%s1877_s0 + $0x58] ss:$20 sps:$4 sm:$0xff]  }
   0xf   :  { %v1485_v39 = vld [vmem:[%s1877_s0 + $0x28] ss:$20 sps:$4 sm:$0xff]   ;;  %v1491_v44 = vld [vmem:[%s1877_s0 + $0x50] ss:$20 sps:$4 sm:$0xff]   ;;  %v1498_v50 = vld [vmem:[%s1877_s0 + $0x78] ss:$20 sps:$4 sm:$0xff]  }
  0x10   :  { %1277 = vmatpush3.bf16.msra.mxu0 %v1456_v14  ;;  %v1487_v41 = vld [vmem:[%s1877_s0 + $0x54] ss:$20 sps:$4 sm:$0xff]   ;;  %v1489_v43 = vld [vmem:[%s1877_s0 + $0x5c] ss:$20 sps:$4 sm:$0xff]   ;;  %v1496_v48 = vld [vmem:[%s1877_s0 + $0x84] ss:$20 sps:$4 sm:$0xff]  }
  0x11   :  { %1341 = vmatpush3.bf16.msra.mxu1 %v1457_v15  ;;  %1278 = vmatprep.subr.bf16.mxu0 %v1458_v16  ;;  %v1506_v46 = vld [vmem:[%s1876_s1 + $0x110] sm:$0xff]   ;;  %v1519_v49 = vld [vmem:[%s1876_s1 + $0x118] sm:$0xff]   ;;  %v1502_v53 = vld [vmem:[%s1877_s0 + $0xac] ss:$20 sps:$4 sm:$0xff]  }
  0x12   :  { %1342 = vmatprep.subr.bf16.mxu1 %v1459_v17  ;;  %v1494_v47 = vld [vmem:[%s1877_s0 + $0x7c] ss:$20 sps:$4 sm:$0xff]   ;;  %v1499_v51 = vld [vmem:[%s1877_s0 + $0x80] ss:$20 sps:$4 sm:$0xff]   ;;  %v1500_v52 = vld [vmem:[%s1877_s0 + $0xa4] ss:$20 sps:$4 sm:$0xff]  }
  0x13   :  { %v1504_v54 = vld [vmem:[%s1877_s0 + $0xa0] ss:$20 sps:$4 sm:$0xff]   ;;  %v1505_v55 = vld [vmem:[%s1877_s0 + $0xa8] ss:$20 sps:$4 sm:$0xff]   ;;  %v1512_v59 = vld [vmem:[%s1877_s0 + $0xd0] ss:$20 sps:$4 sm:$0xff]  }
  0x14   :  { %1279 = vmatpush3.bf16.msra.mxu0 %v1460_v18  ;;  %v1507_v56 = vld [vmem:[%s1877_s0 + $0xcc] ss:$20 sps:$4 sm:$0xff]   ;;  %v1509_v57 = vld [vmem:[%s1877_s0 + $0xd4] ss:$20 sps:$4 sm:$0xff]   ;;  %v1515_v61 = vld [vmem:[%s1877_s0 + $0xfc] ss:$20 sps:$4 sm:$0xff]  }
  0x15   :  { %1343 = vmatpush3.bf16.msra.mxu1 %v1461_v19  ;;  %1280 = vmatprep.subr.bf16.mxu0 %v1462_v20  ;;  %v1511_v58 = vld [vmem:[%s1877_s0 + $0xc8] ss:$20 sps:$4 sm:$0xff]   ;;  %v1517_v62 = vld [vmem:[%s1877_s0 + $0xf0] ss:$20 sps:$4 sm:$0xff]   ;;  %v1518_v63 = vld [vmem:[%s1877_s0 + $0xf8] ss:$20 sps:$4 sm:$0xff]  }
  0x16   :  { %1344 = vmatprep.subr.bf16.mxu1 %v1463_v21  ;;  %v1513_v60 = vld [vmem:[%s1877_s0 + $0xf4] ss:$20 sps:$4 sm:$0xff]   ;;  %v1520_v0 = vld [vmem:[%s1877_s0 + $0x11c] ss:$20 sps:$4 sm:$0xff]   ;;  %v1522_v1 = vld [vmem:[%s1877_s0 + $0x124] ss:$20 sps:$4 sm:$0xff]  }
  0x17   :  { %v1524_v2 = vld [vmem:[%s1877_s0 + $0x118] ss:$20 sps:$4 sm:$0xff]   ;;  %v1525_v3 = vld [vmem:[%s1877_s0 + $0x120] ss:$20 sps:$4 sm:$0xff]   ;;  %v1526_v4 = vld [vmem:[%s1877_s0 + $0x10] ss:$20 sps:$4 sm:$0xff]  }
  0x18   :  { %1281 = vmatpush3.bf16.msra.mxu0 %v1464_v22  ;;  %v1527_v5 = vld [vmem:[%s1877_s0 + $0xb0] ss:$20 sps:$4 sm:$0xff]   ;;  %v1528_v6 = vld [vmem:[%s1877_s0 + $0x38] ss:$20 sps:$4 sm:$0xff]   ;;  %v1530_v8 = vld [vmem:[%s1877_s0 + $0x60] ss:$20 sps:$4 sm:$0xff]  }
  0x19   :  { %1345 = vmatpush3.bf16.msra.mxu1 %v1465_v23  ;;  %1282 = vmatprep.subr.bf16.mxu0 %v1466_v24  ;;  %v1529_v7 = vld [vmem:[%s1877_s0 + $0xd8] ss:$20 sps:$4 sm:$0xff]   ;;  %v1531_v9 = vld [vmem:[%s1877_s0 + $0x100] ss:$20 sps:$4 sm:$0xff]   ;;  %v1532_v10 = vld [vmem:[%s1877_s0 + $0x88] ss:$20 sps:$4 sm:$0xff]  }
  0x1a   :  { %1346 = vmatprep.subr.bf16.mxu1 %v1467_v25  ;;  %v1533_v11 = vld [vmem:[%s1877_s0 + $0x128] ss:$20 sps:$4 sm:$0xff]  }
  0x1c   :  { %1283 = vmatpush3.bf16.msra.mxu0 %v1468_v26 }
  0x1d   :  { %1347 = vmatpush3.bf16.msra.mxu1 %v1469_v27  ;;  %1284 = vmatprep.subr.bf16.mxu0 %v1470_v28 }
  0x1e   :  { %1348 = vmatprep.subr.bf16.mxu1 %v1471_v29 }
  0x20   :  { %1285 = vmatpush3.bf16.msra.mxu0 %v1472_v30 }
  0x21   :  { %1349 = vmatpush3.bf16.msra.mxu1 %v1473_v31  ;;  %1410 = vmatprep.subr.bf16.mxu0 %v1480_v36 }
  0x22   :  { %1434 = vmatprep.subr.bf16.mxu1 %v1480_v36 }
  0x23   :  { %608 = vmatmul.mubr.bf16.vlgmr.msra.gmra.mrb[0].mxu0 %v1474_v32 }
  0x24   :  { %705 = vmatmul.mubr.bf16.vlgmr.msra.gmra.mrb[0].mxu1 %v1477_v34  ;;  %1411 = vmatpush3.bf16.msra.mxu0 %v1480_v36 }
  0x25   :  { %615 = vmatprep.mubr.bf16.mxu0 %v1481_v37  ;;  %712 = vmatprep.mubr.bf16.mxu1 %v1483_v38 }
  0x26   :  { %1438 = vmatpush3.bf16.msra.mxu1 %v1480_v36  ;;  %1412 = vmatprep.subr.bf16.mxu0 %v1493_v42 }
  0x27   :  { %1435 = vmatprep.subr.bf16.mxu1 %v1493_v42 }
  0x28   :  { %1413 = vmatpush3.bf16.msra.mxu0 %v1493_v42 }
  0x29   :  { %1414 = vmatprep.subr.bf16.mxu0 %v1506_v46 }
  0x2a   :  { %1439 = vmatpush3.bf16.msra.mxu1 %v1493_v42 }
  0x2b   :  { %616 = vmatmul.mubr.bf16.gmra.mrb[4].mxu0 %v1485_v39  ;;  %1436 = vmatprep.subr.bf16.mxu1 %v1506_v46 }
  0x2c   :  { %713 = vmatmul.mubr.bf16.gmra.mrb[4].mxu1 %v1486_v40  ;;  %623 = vmatprep.mubr.bf16.mxu0 %v1487_v41 }
  0x2d   :  { %720 = vmatprep.mubr.bf16.mxu1 %v1489_v43  ;;  %1415 = vmatpush3.bf16.msra.mxu0 %v1506_v46 }
  0x2e   :  { %1440 = vmatpush3.bf16.msra.mxu1 %v1506_v46  ;;  %1416 = vmatprep.subr.bf16.mxu0 %v1519_v49 }
  0x2f   :  { %1437 = vmatprep.subr.bf16.mxu1 %v1519_v49 }
  0x31   :  { %1417 = vmatpush3.bf16.msra.mxu0 %v1519_v49 }
  0x32   :  { %1441 = vmatpush3.bf16.msra.mxu1 %v1519_v49 }
  0x33   :  { %624 = vmatmul.mubr.bf16.gmra.mrb[8].mxu0 %v1491_v44 }
  0x34   :  { %721 = vmatmul.mubr.bf16.gmra.mrb[8].mxu1 %v1492_v45  ;;  %631 = vmatprep.mubr.bf16.mxu0 %v1494_v47 }
  0x35   :  { %728 = vmatprep.mubr.bf16.mxu1 %v1496_v48 }
  0x3b   :  { %632 = vmatmul.mubr.bf16.gmra.mrb[12].mxu0 %v1498_v50 }
  0x3c   :  { %729 = vmatmul.mubr.bf16.gmra.mrb[12].mxu1 %v1499_v51  ;;  %639 = vmatprep.mubr.bf16.mxu0 %v1500_v52 }
  0x3d   :  { %736 = vmatprep.mubr.bf16.mxu1 %v1502_v53 }
  0x43   :  { %640 = vmatmul.mubr.bf16.gmra.mrb[16].mxu0 %v1504_v54 }
  0x44   :  { %737 = vmatmul.mubr.bf16.gmra.mrb[16].mxu1 %v1505_v55  ;;  %647 = vmatprep.mubr.bf16.mxu0 %v1507_v56 }
  0x45   :  { %744 = vmatprep.mubr.bf16.mxu1 %v1509_v57 }
  0x4b   :  { %648 = vmatmul.mubr.bf16.gmra.mrb[20].mxu0 %v1511_v58 }
  0x4c   :  { %745 = vmatmul.mubr.bf16.gmra.mrb[20].mxu1 %v1512_v59  ;;  %655 = vmatprep.mubr.bf16.mxu0 %v1513_v60 }
  0x4d   :  { %752 = vmatprep.mubr.bf16.mxu1 %v1515_v61 }
  0x53   :  { %656 = vmatmul.mubr.bf16.gmra.mrb[24].mxu0 %v1517_v62 }
  0x54   :  { %753 = vmatmul.mubr.bf16.gmra.mrb[24].mxu1 %v1518_v63  ;;  %663 = vmatprep.mubr.bf16.mxu0 %v1520_v0 }
  0x55   :  { %760 = vmatprep.mubr.bf16.mxu1 %v1522_v1 }
  0x5b   :  { %664 = vmatmul.mubr.bf16.gmra.mrb[28].mxu0 %v1524_v2 }
  0x5c   :  { %761 = vmatmul.mubr.bf16.gmra.mrb[28].mxu1 %v1525_v3  ;;  %1418 = vmatprep.mubr.msk.bf16.mxu0 %vm550_vm0, %v1526_v4 }
  0x5d   :  { %1426 = vmatprep.mubr.msk.bf16.mxu1 %vm550_vm0, %v1527_v5 }
  0x63   :  { %1419 = vmatmul.mubr.msk.bf16.vlgmr.msra.gmra.mrb[32].mxu0 %vm550_vm0, %v1528_v6 }
  0x64   :  { %1427 = vmatmul.mubr.msk.bf16.vlgmr.msra.gmra.mrb[32].mxu1 %vm550_vm0, %v1529_v7  ;;  %1422 = vmatprep.mubr.msk.bf16.mxu0 %vm550_vm0, %v1530_v8 }
  0x65   :  { %1430 = vmatprep.mubr.msk.bf16.mxu1 %vm550_vm0, %v1531_v9 }
  0x6b   :  { %1423 = vmatmul.mubr.msk.bf16.gmra.mrb[36].mxu0 %vm550_vm0, %v1532_v10 }
  0x6c   :  { %1431 = vmatmul.mubr.msk.bf16.gmra.mrb[36].mxu1 %vm550_vm0, %v1533_v11 }
  0xf6   :  { %v1286_v12 = vpop.f32.mrb[0].mxu0 }
  0xf7   :  { %v1350_v13 = vpop.f32.mrb[0].mxu1  ;;  %v1287_v14 = vpop.f32.mrb[1].mxu0 }
  0xf8   :  { %v1288_v15 = vadd.f32 %v1287_v14, %v1286_v12  ;;  %v1351_v16 = vpop.f32.mrb[1].mxu1  ;;  %v1289_v17 = vpop.f32.mrb[2].mxu0 }
  0xf9   :  { %v1352_v18 = vadd.f32 %v1351_v16, %v1350_v13  ;;  %v1353_v19 = vpop.f32.mrb[2].mxu1  ;;  %v1290_v20 = vpop.f32.mrb[3].mxu0 }
  0xfa   :  { %v1291_v21 = vadd.f32 %v1290_v20, %v1289_v17  ;;  %v1354_v22 = vpop.f32.mrb[3].mxu1 }
  0xfb   :  { %v1355_v23 = vadd.f32 %v1354_v22, %v1353_v19  ;;  %v1790_v24 = vadd.f32 %v1352_v18, %v1288_v15 }
  0xfd   :  { %v1792_v25 = vadd.f32 %v1355_v23, %v1291_v21 }
  0xfe   :  { %v1292_v26 = vpop.f32.mrb[4].mxu0 }
  0xff   :  { %v1356_v27 = vpop.f32.mrb[4].mxu1  ;;  %v1293_v28 = vpop.f32.mrb[5].mxu0 }
 0x100   :  { %v1294_v29 = vadd.f32 %v1293_v28, %v1292_v26  ;;  %v1357_v30 = vpop.f32.mrb[5].mxu1  ;;  %v1295_v31 = vpop.f32.mrb[6].mxu0 }
 0x101   :  { %v1358_v32 = vadd.f32 %v1357_v30, %v1356_v27  ;;  %v1359_v33 = vpop.f32.mrb[6].mxu1  ;;  %v1296_v34 = vpop.f32.mrb[7].mxu0 }
 0x102   :  { %v1297_v35 = vadd.f32 %v1296_v34, %v1295_v31  ;;  %v1360_v36 = vpop.f32.mrb[7].mxu1 }
 0x103   :  { %v1361_v37 = vadd.f32 %v1360_v36, %v1359_v33  ;;  %v1794_v38 = vadd.f32 %v1358_v32, %v1294_v29 }
 0x105   :  { %v1796_v39 = vadd.f32 %v1361_v37, %v1297_v35 }
 0x106   :  { %v1298_v40 = vpop.f32.mrb[8].mxu0 }
 0x107   :  { %v1362_v41 = vpop.f32.mrb[8].mxu1  ;;  %v1299_v42 = vpop.f32.mrb[9].mxu0 }
 0x108   :  { %v1300_v43 = vadd.f32 %v1299_v42, %v1298_v40  ;;  %v1363_v44 = vpop.f32.mrb[9].mxu1  ;;  %v1301_v45 = vpop.f32.mrb[10].mxu0 }
 0x109   :  { %v1364_v46 = vadd.f32 %v1363_v44, %v1362_v41  ;;  %v1365_v47 = vpop.f32.mrb[10].mxu1  ;;  %v1302_v48 = vpop.f32.mrb[11].mxu0 }
 0x10a   :  { %v1303_v49 = vadd.f32 %v1302_v48, %v1301_v45  ;;  %v1366_v50 = vpop.f32.mrb[11].mxu1 }
 0x10b   :  { %v1367_v51 = vadd.f32 %v1366_v50, %v1365_v47  ;;  %v1798_v52 = vadd.f32 %v1364_v46, %v1300_v43 }
 0x10d   :  { %v1800_v53 = vadd.f32 %v1367_v51, %v1303_v49 }
 0x10e   :  { %v1304_v54 = vpop.f32.mrb[12].mxu0 }
 0x10f   :  { %v1368_v55 = vpop.f32.mrb[12].mxu1  ;;  %v1305_v56 = vpop.f32.mrb[13].mxu0 }
 0x110   :  { %v1306_v57 = vadd.f32 %v1305_v56, %v1304_v54  ;;  %v1369_v58 = vpop.f32.mrb[13].mxu1  ;;  %v1307_v59 = vpop.f32.mrb[14].mxu0 }
 0x111   :  { %v1370_v60 = vadd.f32 %v1369_v58, %v1368_v55  ;;  %v1371_v61 = vpop.f32.mrb[14].mxu1  ;;  %v1308_v62 = vpop.f32.mrb[15].mxu0 }
 0x112   :  { %v1309_v63 = vadd.f32 %v1308_v62, %v1307_v59  ;;  %v1372_v0 = vpop.f32.mrb[15].mxu1 }
 0x113   :  { %v1373_v1 = vadd.f32 %v1372_v0, %v1371_v61  ;;  %v1802_v2 = vadd.f32 %v1370_v60, %v1306_v57 }
 0x115   :  { %v1804_v3 = vadd.f32 %v1373_v1, %v1309_v63 }
 0x116   :  { %v1310_v4 = vpop.f32.mrb[16].mxu0 }
 0x117   :  { %v1374_v5 = vpop.f32.mrb[16].mxu1  ;;  %v1311_v6 = vpop.f32.mrb[17].mxu0 }
 0x118   :  { %v1312_v7 = vadd.f32 %v1311_v6, %v1310_v4  ;;  %v1375_v8 = vpop.f32.mrb[17].mxu1  ;;  %v1313_v9 = vpop.f32.mrb[18].mxu0 }
 0x119   :  { %v1376_v10 = vadd.f32 %v1375_v8, %v1374_v5  ;;  %v1377_v11 = vpop.f32.mrb[18].mxu1  ;;  %v1314_v12 = vpop.f32.mrb[19].mxu0 }
 0x11a   :  { %v1315_v13 = vadd.f32 %v1314_v12, %v1313_v9  ;;  %v1378_v14 = vpop.f32.mrb[19].mxu1 }
 0x11b   :  { %v1379_v15 = vadd.f32 %v1378_v14, %v1377_v11  ;;  %v739_v16 = vadd.f32 %v1376_v10, %v1312_v7 }
 0x11d   :  { %v742_v17 = vadd.f32 %v1379_v15, %v1315_v13 }
 0x11e   :  { %v1316_v18 = vpop.f32.mrb[20].mxu0 }
 0x11f   :  { %v1380_v19 = vpop.f32.mrb[20].mxu1  ;;  %v1317_v20 = vpop.f32.mrb[21].mxu0 }
 0x120   :  { %v1318_v21 = vadd.f32 %v1317_v20, %v1316_v18  ;;  %v1381_v22 = vpop.f32.mrb[21].mxu1  ;;  %v1319_v23 = vpop.f32.mrb[22].mxu0 }
 0x121   :  { %v1382_v26 = vadd.f32 %v1381_v22, %v1380_v19  ;;  %v1383_v27 = vpop.f32.mrb[22].mxu1  ;;  %v1320_v28 = vpop.f32.mrb[23].mxu0 }
 0x122   :  { %v1321_v29 = vadd.f32 %v1320_v28, %v1319_v23  ;;  %v1384_v30 = vpop.f32.mrb[23].mxu1 }
 0x123   :  { %v1385_v31 = vadd.f32 %v1384_v30, %v1383_v27  ;;  %v747_v32 = vadd.f32 %v1382_v26, %v1318_v21 }
 0x125   :  { %v750_v33 = vadd.f32 %v1385_v31, %v1321_v29 }
 0x126   :  { %v1322_v34 = vpop.f32.mrb[24].mxu0 }
 0x127   :  { %v1386_v35 = vpop.f32.mrb[24].mxu1  ;;  %v1323_v36 = vpop.f32.mrb[25].mxu0 }
 0x128   :  { %v1324_v37 = vadd.f32 %v1323_v36, %v1322_v34  ;;  %v1387_v40 = vpop.f32.mrb[25].mxu1  ;;  %v1325_v41 = vpop.f32.mrb[26].mxu0 }
 0x129   :  { %v1388_v42 = vadd.f32 %v1387_v40, %v1386_v35  ;;  %v1389_v43 = vpop.f32.mrb[26].mxu1  ;;  %v1326_v44 = vpop.f32.mrb[27].mxu0 }
 0x12a   :  { %v1327_v45 = vadd.f32 %v1326_v44, %v1325_v41  ;;  %v1390_v46 = vpop.f32.mrb[27].mxu1 }
 0x12b   :  { %v1391_v47 = vadd.f32 %v1390_v46, %v1389_v43  ;;  %v755_v48 = vadd.f32 %v1388_v42, %v1324_v37 }
 0x12d   :  { %v758_v49 = vadd.f32 %v1391_v47, %v1327_v45 }
 0x12e   :  { %v1328_v50 = vpop.f32.mrb[28].mxu0 }
 0x12f   :  { %v1392_v51 = vpop.f32.mrb[28].mxu1  ;;  %v1329_v54 = vpop.f32.mrb[29].mxu0 }
 0x130   :  { %v1330_v55 = vadd.f32 %v1329_v54, %v1328_v50  ;;  %v1393_v56 = vpop.f32.mrb[29].mxu1  ;;  %v1331_v57 = vpop.f32.mrb[30].mxu0 }
 0x131   :  { %v1394_v58 = vadd.f32 %v1393_v56, %v1392_v51  ;;  %v1395_v59 = vpop.f32.mrb[30].mxu1  ;;  %v1332_v60 = vpop.f32.mrb[31].mxu0 }
 0x132   :  { %v1333_v61 = vadd.f32 %v1332_v60, %v1331_v57  ;;  %v1396_v62 = vpop.f32.mrb[31].mxu1 }
 0x133   :  { %v1397_v63 = vadd.f32 %v1396_v62, %v1395_v59  ;;  %v763_v0 = vadd.f32 %v1394_v58, %v1330_v55 }
 0x135   :  { %v766_v1 = vadd.f32 %v1397_v63, %v1333_v61 }
 0x136   :  { %v1420_v4 = vpop.f32.mrb[32].mxu0 }
 0x137   :  { %v1807_v5 = vadd.f32 %v1420_v4, %v1794_v38  ;;  %v1428_v6 = vpop.f32.mrb[32].mxu1  ;;  %v803_v7 = vpop.f32.mrb[33].mxu0 }
 0x138   :  { %v1809_v8 = vadd.f32 %v1428_v6, %v747_v32  ;;  %v1812_v9 = vadd.f32 %v803_v7, %v1790_v24  ;;  %v835_v10 = vpop.f32.mrb[33].mxu1  ;;  %v1421_v11 = vpop.f32.mrb[34].mxu0 }
 0x139   :  { %v1814_v12 = vadd.f32 %v835_v10, %v739_v16  ;;  %v1817_v13 = vadd.f32 %v1421_v11, %v1796_v39  ;;  %v1429_v14 = vpop.f32.mrb[34].mxu1  ;;  %v806_v15 = vpop.f32.mrb[35].mxu0 }
 0x13a   :  { %v1819_v18 = vadd.f32 %v1429_v14, %v750_v33  ;;  %v807_v38 = vadd.f32 %v806_v15, %v1792_v25  ;;  %v838_v19 = vpop.f32.mrb[35].mxu1 }
 0x13b   :  { %v1231_v20 = vpack.c.bf16 %v1817_v13, %v1807_v5  ;;  %v1824_v21 = vadd.f32 %v838_v19, %v742_v17 }
 0x13c   :  { %v1251_v24 = vpack.c.bf16 %v1819_v18, %v1809_v8  ;;  %v924_v16 = vadd.f32 %v807_v38, %v1812_v9  ;;  %v1226_v39 = vpack.c.bf16 %v807_v38, %v1812_v9 }
 0x13d   :  { %1263 = vst [vmem:[%s1878_s2 + $0x8] sm:$0xff] %v1231_v20   ;;  %v1246_v25 = vpack.c.bf16 %v1824_v21, %v1814_v12 }
 0x13e   :  { %1267 = vst [vmem:[%s1878_s2 + $0x28] sm:$0xff] %v1251_v24   ;;  %v925_v17 = vadd.f32 %v924_v16, %v1807_v5  ;;  %1227 = vst [vmem:[%s1878_s2] sm:$0xff] %v1226_v39   ;;  %v1424_v22 = vpop.f32.mrb[36].mxu0 }
 0x13f   :  { %1266 = vst [vmem:[%s1878_s2 + $0x20] sm:$0xff] %v1246_v25   ;;  %v828_v23 = vadd.f32 %v1424_v22, %v1802_v2  ;;  %v1432_v26 = vpop.f32.mrb[36].mxu1  ;;  %v819_v27 = vpop.f32.mrb[37].mxu0 }
 0x140   :  { %v860_v28 = vadd.f32 %v1432_v26, %v763_v0  ;;  %v820_v29 = vadd.f32 %v819_v27, %v1798_v52  ;;  %v926_v30 = vadd.f32 %v925_v17, %v1817_v13  ;;  %v851_v31 = vpop.f32.mrb[37].mxu1  ;;  %v1425_v32 = vpop.f32.mrb[38].mxu0 }
 0x141   :  { %v852_v33 = vadd.f32 %v851_v31, %v755_v48  ;;  %v831_v34 = vadd.f32 %v1425_v32, %v1804_v3  ;;  %v1433_v35 = vpop.f32.mrb[38].mxu1  ;;  %v822_v36 = vpop.f32.mrb[39].mxu0 }
 0x142   :  { %v927_v37 = vadd.f32 %v926_v30, %v820_v29  ;;  %v863_v40 = vadd.f32 %v1433_v35, %v766_v1  ;;  %v823_v41 = vadd.f32 %v822_v36, %v1800_v53  ;;  %v854_v42 = vpop.f32.mrb[39].mxu1 }
 0x143   :  { %v1241_v2 = vpack.c.bf16 %v831_v34, %v828_v23  ;;  %v855_v43 = vadd.f32 %v854_v42, %v758_v49 }
 0x144   :  { %v1261_v44 = vpack.c.bf16 %v863_v40, %v860_v28  ;;  %v928_v45 = vadd.f32 %v927_v37, %v823_v41  ;;  %v1236_v46 = vpack.c.bf16 %v823_v41, %v820_v29 }
 0x145   :  { %1265 = vst [vmem:[%s1878_s2 + $0x18] sm:$0xff] %v1241_v2   ;;  %v1256_v52 = vpack.c.bf16 %v855_v43, %v852_v33 }
 0x146   :  { %1269 = vst [vmem:[%s1878_s2 + $0x38] sm:$0xff] %v1261_v44   ;;  %v929_v3 = vadd.f32 %v928_v45, %v828_v23  ;;  %1264 = vst [vmem:[%s1878_s2 + $0x10] sm:$0xff] %v1236_v46  }
 0x147   :  { %1268 = vst [vmem:[%s1878_s2 + $0x30] sm:$0xff] %v1256_v52  }
 0x148   :  { %v930_v53 = vadd.f32 %v929_v3, %v831_v34 }
 0x14a   :  { %v931_v47 = vadd.f32 %v930_v53, %v1814_v12 }
 0x14c   :  { %v932_v48 = vadd.f32 %v931_v47, %v1824_v21 }
 0x14e   :  { %v933_v49 = vadd.f32 %v932_v48, %v1809_v8 }
 0x150   :  { %v934_v50 = vadd.f32 %v933_v49, %v1819_v18 }
 0x152   :  { %v935_v51 = vadd.f32 %v934_v50, %v852_v33 }
 0x154   :  { %v936_v54 = vadd.f32 %v935_v51, %v855_v43 }
 0x156   :  { %v937_v55 = vadd.f32 %v936_v54, %v860_v28 }
 0x158   :  { %v938_v56 = vadd.f32 %v937_v55, %v863_v40 }
 0x15a   :  { %v939_v57 = vrot.slane %v938_v56, 4 }
 0x15c   :  { %v940_v58 = vadd.f32 %v939_v57, %v938_v56 }
 0x15e   :  { %v941_v59 = vrot.slane %v940_v58, 2 }
 0x160   :  { %v942_v60 = vadd.f32 %v941_v59, %v940_v58 }
 0x162   :  { %v943_v61 = vrot.slane %v942_v60, 1 }
 0x164   :  { %v944_v62 = vadd.f32 %v943_v61, %v942_v60 }
 0x166   :  { %v946_v63 = vmul.f32 0.0078125, %v944_v62 }
 0x168   :  { %v947_v0 = vsub.f32 %v1812_v9, %v946_v63  ;;  %v948_v1 = vsub.f32 %v807_v38, %v946_v63  ;;  %v949_v4 = vsub.f32 %v1807_v5, %v946_v63  ;;  %v950_v6 = vsub.f32 %v1817_v13, %v946_v63 }
 0x169   :  { %v951_v7 = vsub.f32 %v820_v29, %v946_v63  ;;  %v952_v10 = vsub.f32 %v823_v41, %v946_v63  ;;  %v953_v11 = vsub.f32 %v828_v23, %v946_v63  ;;  %v954_v14 = vsub.f32 %v831_v34, %v946_v63 }
 0x16a   :  { %v955_v15 = vsub.f32 %v1814_v12, %v946_v63  ;;  %v956_v19 = vsub.f32 %v1824_v21, %v946_v63  ;;  %v957_v20 = vsub.f32 %v1809_v8, %v946_v63  ;;  %v958_v24 = vsub.f32 %v1819_v18, %v946_v63 }
 0x16b   :  { %v959_v16 = vsub.f32 %v852_v33, %v946_v63  ;;  %v960_v39 = vsub.f32 %v855_v43, %v946_v63  ;;  %v961_v9 = vsub.f32 %v860_v28, %v946_v63  ;;  %v962_v38 = vsub.f32 %v863_v40, %v946_v63 }
 0x16c   :  { %v979_v25 = vmul.f32 %v947_v0, %v947_v0  ;;  %v980_v5 = vmul.f32 %v948_v1, %v948_v1  ;;  %v981_v17 = vmul.f32 %v949_v4, %v949_v4  ;;  %v982_v22 = vmul.f32 %v950_v6, %v950_v6 }
 0x16d   :  { %v983_v23 = vmul.f32 %v951_v7, %v951_v7  ;;  %v984_v29 = vmul.f32 %v952_v10, %v952_v10  ;;  %v985_v30 = vmul.f32 %v953_v11, %v953_v11  ;;  %v986_v31 = vmul.f32 %v954_v14, %v954_v14 }
 0x16e   :  { %v995_v13 = vadd.f32 %v980_v5, %v979_v25  ;;  %v987_v32 = vmul.f32 %v955_v15, %v955_v15  ;;  %v988_v33 = vmul.f32 %v956_v19, %v956_v19  ;;  %v989_v28 = vmul.f32 %v957_v20, %v957_v20 }
 0x16f   :  { %v990_v36 = vmul.f32 %v958_v24, %v958_v24  ;;  %v991_v40 = vmul.f32 %v959_v16, %v959_v16  ;;  %v992_v42 = vmul.f32 %v960_v39, %v960_v39  ;;  %v993_v43 = vmul.f32 %v961_v9, %v961_v9 }
 0x170   :  { %v996_v26 = vadd.f32 %v995_v13, %v981_v17  ;;  %v994_v45 = vmul.f32 %v962_v38, %v962_v38 }
 0x172   :  { %v997_v27 = vadd.f32 %v996_v26, %v982_v22 }
 0x174   :  { %v998_v12 = vadd.f32 %v997_v27, %v983_v23 }
 0x176   :  { %v999_v21 = vadd.f32 %v998_v12, %v984_v29 }
 0x178   :  { %v1000_v8 = vadd.f32 %v999_v21, %v985_v30 }
 0x17a   :  { %v1001_v18 = vadd.f32 %v1000_v8, %v986_v31 }
 0x17c   :  { %v1002_v34 = vadd.f32 %v1001_v18, %v987_v32 }
 0x17e   :  { %v1003_v35 = vadd.f32 %v1002_v34, %v988_v33 }
 0x180   :  { %v1004_v37 = vadd.f32 %v1003_v35, %v989_v28 }
 0x182   :  { %v1005_v41 = vadd.f32 %v1004_v37, %v990_v36 }
 0x184   :  { %v1006_v2 = vadd.f32 %v1005_v41, %v991_v40 }
 0x186   :  { %v1007_v44 = vadd.f32 %v1006_v2, %v992_v42 }
 0x188   :  { %v1008_v46 = vadd.f32 %v1007_v44, %v993_v43 }
 0x18a   :  { %v1009_v52 = vadd.f32 %v1008_v46, %v994_v45 }
 0x18c   :  { %v1010_v3 = vrot.slane %v1009_v52, 4 }
 0x18e   :  { %v1011_v53 = vadd.f32 %v1010_v3, %v1009_v52 }
 0x190   :  { %v1012_v47 = vrot.slane %v1011_v53, 2 }
 0x192   :  { %v1013_v48 = vadd.f32 %v1012_v47, %v1011_v53 }
 0x194   :  { %v1014_v49 = vrot.slane %v1013_v48, 1 }
 0x196   :  { %v1015_v50 = vadd.f32 %v1014_v49, %v1013_v48 }
 0x198   :  { %v1017_v51 = vsel %vm1016_vm1, %v944_v62, %v1015_v50 }
 0x199   :  { %1018 = vst [vmem:[%s1879_s3] sm:$0x3] %v1017_v51 }

</bundles_post_ra>
